<compile_context>
chip_gen: v5e
topology: v5e:2x2
jax: 0.10.0
libtpu: 0.0.40
codegen_flags: <defaults>
</compile_context>

<pallas_src>
import numpy as np
import jax
import jax.numpy as jnp
from jax.experimental import pallas as pl
from jax.experimental.pallas import tpu as pltpu

DILATIONS = (1, 2, 4)   # (conv, gwconv, gwconv_shift)
PAD_C = 4               # column halo = max dilation * (k-1)/2
PAD_R = 5               # row halo + 1 extra row so every flat tap slice is in bounds


def _grouped_to_dense(w_grp, cin, parts):
    """(Cout, Cin//parts, 3, 3) grouped weight -> (Cout, Cin, 3, 3) dense."""
    cout = w_grp.shape[0]
    ocp, icp = cout // parts, cin // parts
    wd = jnp.zeros((cout, cin, 3, 3), w_grp.dtype)
    for g in range(parts):
        wd = wd.at[g * ocp:(g + 1) * ocp, g * icp:(g + 1) * icp].set(
            w_grp[g * ocp:(g + 1) * ocp])
    return wd


def _num_batch_blocks(n):
    """Grid steps over the batch: 1 on single-TC v5e/v6e, 2 on dual-TC v7x."""
    try:
        kind = jax.devices()[0].device_kind.lower()
    except Exception:
        kind = ""
    if "v7" in kind and n >= 2 and n % 2 == 0:
        return 2   # keep a 2-way parallel axis so both TensorCores run
    return 1       # single TC: one grid step, one big matmul


def psconv2d_forward(x_nchw, w_conv, w_gw, w_gws, parts=4):
    N, Cin, H, W = x_nchw.shape
    Cout = w_conv.shape[0]

    Wp = W + 2 * PAD_C            # padded width
    Hp = H + 2 * PAD_R            # padded height
    L = H * Wp                    # flattened output length per image
    Lp = Hp * Wp                  # flattened padded input length per image
    KK = 27 * Cin                 # fused contraction dim (3 dils * 9 taps * Cin)

    n_blocks = _num_batch_blocks(N)
    B_blk = N // n_blocks         # images per grid step

    # ---- Fold the three convolutions into one (Cout, 27*Cin) bf16 slab -----
    wd_gw = _grouped_to_dense(w_gw, Cin, parts)
    wd_gws = _grouped_to_dense(w_gws, Cin, parts)
    # Fold cat(x2, x1) into the shift-conv weight: rolled input channel c
    # corresponds to original channel (c + Cin/2) % Cin.
    wd_gws_eff = jnp.roll(wd_gws, shift=Cin // 2, axis=1)

    # (3, Cout, Cin, 3, 3) in dilation order (1: conv, 2: gwconv, 4: shift)
    w_stack = jnp.stack([w_conv, wd_gw, wd_gws_eff], axis=0)
    # -> (Cout, di, kh, kw, Cin) -> (Cout, 27*Cin); column = tap*Cin + cin
    w2 = jnp.transpose(w_stack, (1, 0, 3, 4, 2)).reshape(Cout, KK)
    w2 = w2.astype(jnp.bfloat16)

    # ---- Pad spatially in bf16 (halves HBM + copy traffic) and flatten -----
    x_pad = jnp.pad(
        x_nchw.astype(jnp.bfloat16),
        ((0, 0), (0, 0), (PAD_R, PAD_R), (PAD_C, PAD_C)))
    x_flat = x_pad.reshape(N, Cin, Lp)

    # Static flat tap offsets; order must match the weight column order above.
    offs = [(kh - 1) * d * Wp + (kw - 1) * d
            for d in DILATIONS for kh in range(3) for kw in range(3)]
    p0 = PAD_R * Wp   # flat index of the first computed output row

    def psconv_kernel(x_ref, w_ref, o_ref, stk_ref):
        # x_ref  : (B_blk, Cin, Lp)      bf16 padded, flattened images
        # w_ref  : (Cout, 27*Cin)        bf16 fused weight slab
        # o_ref  : (B_blk, Cout, L)      f32  flattened NCHW output (padded cols kept)
        # stk_ref: (27*Cin, B_blk*L)     bf16 stacked-patch scratch
        #
        # Cast-free copies: x is already bf16, so each tap copy is a single
        # load + store (no separate cast pass over the scratch).
        # TODO(synk): share one base-window load per (dilation, kh) row and
        # derive the 3 kw taps with pltpu.roll to cut redundant vld traffic.
        for img in range(B_blk):
            c0 = img * L                       # lane-aligned (L % 128 == 0)
            for t, off in enumerate(offs):
                s = p0 + off                   # static offset
                stk_ref[t * Cin:(t + 1) * Cin, c0:c0 + L] = x_ref[img, :, s:s + L]
        # One K = 27*Cin matmul over all images of the block (N dim = B_blk*L).
        acc = jnp.dot(w_ref[...], stk_ref[...],
                      preferred_element_type=jnp.float32)
        for img in range(B_blk):
            o_ref[img] = acc[:, img * L:(img + 1) * L]

    out_flat = pl.pallas_call(
        psconv_kernel,
        out_shape=jax.ShapeDtypeStruct((N, Cout, L), jnp.float32),
        grid_spec=pltpu.PrefetchScalarGridSpec(
            num_scalar_prefetch=0,
            grid=(n_blocks,),
            in_specs=[
                pl.BlockSpec((B_blk, Cin, Lp), lambda i: (i, 0, 0)),
                pl.BlockSpec((Cout, KK), lambda i: (0, 0)),
            ],
            out_specs=pl.BlockSpec((B_blk, Cout, L), lambda i: (i, 0, 0)),
            scratch_shapes=[pltpu.VMEM((KK, B_blk * L), jnp.bfloat16)],
        ),
        compiler_params=pltpu.CompilerParams(
            dimension_semantics=("parallel",)),
    )(x_flat, w2)

    # (N, Cout, H*Wp) -> (N, Cout, H, Wp) -> drop padded columns -> NCHW output.
    return out_flat.reshape(N, Cout, H, Wp)[:, :, :, PAD_C:PAD_C + W]


def ref_forward(x, w_conv, w_gw, w_gws, parts=4):
    """Pure-JAX reference matching the PyTorch forward (NCHW)."""
    dn = ("NCHW", "OIHW", "NCHW")

    def conv(x, w, pad, dil, groups):
        return jax.lax.conv_general_dilated(
            x, w, window_strides=(1, 1), padding=((pad, pad), (pad, pad)),
            rhs_dilation=(dil, dil), dimension_numbers=dn,
            feature_group_count=groups)

    C = x.shape[1]
    x1, x2 = x[:, :C // 2], x[:, C // 2:]
    x_shift_in = jnp.concatenate([x2, x1], axis=1)
    return (conv(x, w_gw, 2, 2, parts)
            + conv(x, w_conv, 1, 1, 1)
            + conv(x_shift_in, w_gws, 4, 4, parts))


if __name__ == "__main__":
    # Small deterministic config consistent with PSConv2d(in=8, out=8, parts=4).
    N, Cin, H, W = 2, 8, 16, 16
    Cout, parts = 8, 4

    key = jax.random.PRNGKey(0)
    kx, k1, k2, k3 = jax.random.split(key, 4)

    x = jax.random.normal(kx, (N, Cin, H, W), dtype=jnp.float32)

    # Parameter shapes from the module's __init__ (bias=False):
    w_gw = jax.random.normal(k1, (Cout, Cin // parts, 3, 3), jnp.float32) * 0.1
    w_gws = jax.random.normal(k2, (Cout, Cin // parts, 3, 3), jnp.float32) * 0.1
    w_conv = jax.random.normal(k3, (Cout, Cin, 3, 3), jnp.float32) * 0.1

    # Replicate the __init__ masking: zero block-diag(+shifted) blocks of conv.weight.
    mask = np.zeros((Cout, Cin, 3, 3), dtype=bool)
    ocp, icp = Cout // parts, Cin // parts
    for i in range(parts):
        mask[i * ocp:(i + 1) * ocp, i * icp:(i + 1) * icp] = True
        j = (i + parts // 2) % parts
        mask[j * ocp:(j + 1) * ocp, i * icp:(i + 1) * icp] = True
    w_conv = jnp.where(jnp.asarray(mask), 0.0, w_conv)

    out = psconv2d_forward(x, w_conv, w_gw, w_gws, parts=parts)
    out = jax.block_until_ready(out)

    ref = jax.block_until_ready(ref_forward(x, w_conv, w_gw, w_gws, parts=parts))
    assert out.shape == (N, Cout, H, W)
    # bf16 MXU operands (f32 accumulation) -> loosened tolerance vs f32 ref.
    np.testing.assert_allclose(np.asarray(out), np.asarray(ref), rtol=5e-2, atol=5e-2)

    print("KERNEL_OK")
</pallas_src>

<mosaic_0001>
module attributes {stable_mosaic.version = 11 : i64} {
  func.func @psconv_kernel(%arg0: i32, %arg1: memref<2x8x624xbf16, #tpu.memory_space<vmem>>, %arg2: memref<8x216xbf16, #tpu.memory_space<vmem>>, %arg3: memref<2x8x384xf32, #tpu.memory_space<vmem>>, %arg4: memref<216x768xbf16, #tpu.memory_space<vmem>>) attributes {dimension_semantics = [#tpu.dimension_semantics<parallel>], iteration_bounds = array<i64: 1>, scalar_prefetch = 0 : i64, scratch_operands = 1 : i64, tpu.core_type = #tpu.core_type<tc>, window_params = [{transform_indices = @transform_0, window_bounds = array<i64: 2, 8, 624>}, {pipeline_mode = #tpu.pipeline_mode<synchronous>, transform_indices = @transform_1, window_bounds = array<i64: 8, 216>}, {transform_indices = @transform_2, window_bounds = array<i64: 2, 8, 384>}]} {
    %c0 = arith.constant 0 : index
    %c0_0 = arith.constant 0 : index
    %c95 = arith.constant 95 : index
    %0 = vector.load %arg1[%c0, %c0_0, %c95] : memref<2x8x624xbf16, #tpu.memory_space<vmem>>, vector<1x8x384xbf16>
    %1 = vector.shape_cast %0 : vector<1x8x384xbf16> to vector<8x384xbf16>
    %c0_1 = arith.constant 0 : index
    %c0_2 = arith.constant 0 : index
    %2 = vector.load %arg4[%c0_1, %c0_2] : memref<216x768xbf16, #tpu.memory_space<vmem>>, vector<8x384xbf16>
    tpu.vector_store %arg4[%c0_1, %c0_2], %1 {strides = array<i32>} : memref<216x768xbf16, #tpu.memory_space<vmem>>, vector<8x384xbf16>,
    %c0_3 = arith.constant 0 : index
    %c0_4 = arith.constant 0 : index
    %c96 = arith.constant 96 : index
    %3 = vector.load %arg1[%c0_3, %c0_4, %c96] : memref<2x8x624xbf16, #tpu.memory_space<vmem>>, vector<1x8x384xbf16>
    %4 = vector.shape_cast %3 : vector<1x8x384xbf16> to vector<8x384xbf16>
    %c8 = arith.constant 8 : index
    %c0_5 = arith.constant 0 : index
    %5 = vector.load %arg4[%c8, %c0_5] : memref<216x768xbf16, #tpu.memory_space<vmem>>, vector<8x384xbf16>
    tpu.vector_store %arg4[%c8, %c0_5], %4 {strides = array<i32>} : memref<216x768xbf16, #tpu.memory_space<vmem>>, vector<8x384xbf16>,
    %c0_6 = arith.constant 0 : index
    %c0_7 = arith.constant 0 : index
    %c97 = arith.constant 97 : index
    %6 = vector.load %arg1[%c0_6, %c0_7, %c97] : memref<2x8x624xbf16, #tpu.memory_space<vmem>>, vector<1x8x384xbf16>
    %7 = vector.shape_cast %6 : vector<1x8x384xbf16> to vector<8x384xbf16>
    %c16 = arith.constant 16 : index
    %c0_8 = arith.constant 0 : index
    %8 = vector.load %arg4[%c16, %c0_8] : memref<216x768xbf16, #tpu.memory_space<vmem>>, vector<8x384xbf16>
    tpu.vector_store %arg4[%c16, %c0_8], %7 {strides = array<i32>} : memref<216x768xbf16, #tpu.memory_space<vmem>>, vector<8x384xbf16>,
    %c0_9 = arith.constant 0 : index
    %c0_10 = arith.constant 0 : index
    %c119 = arith.constant 119 : index
    %9 = vector.load %arg1[%c0_9, %c0_10, %c119] : memref<2x8x624xbf16, #tpu.memory_space<vmem>>, vector<1x8x384xbf16>
    %10 = vector.shape_cast %9 : vector<1x8x384xbf16> to vector<8x384xbf16>
    %c24 = arith.constant 24 : index
    %c0_11 = arith.constant 0 : index
    %11 = vector.load %arg4[%c24, %c0_11] : memref<216x768xbf16, #tpu.memory_space<vmem>>, vector<8x384xbf16>
    tpu.vector_store %arg4[%c24, %c0_11], %10 {strides = array<i32>} : memref<216x768xbf16, #tpu.memory_space<vmem>>, vector<8x384xbf16>,
    %c0_12 = arith.constant 0 : index
    %c0_13 = arith.constant 0 : index
    %c120 = arith.constant 120 : index
    %12 = vector.load %arg1[%c0_12, %c0_13, %c120] : memref<2x8x624xbf16, #tpu.memory_space<vmem>>, vector<1x8x384xbf16>
    %13 = vector.shape_cast %12 : vector<1x8x384xbf16> to vector<8x384xbf16>
    %c32 = arith.constant 32 : index
    %c0_14 = arith.constant 0 : index
    %14 = vector.load %arg4[%c32, %c0_14] : memref<216x768xbf16, #tpu.memory_space<vmem>>, vector<8x384xbf16>
    tpu.vector_store %arg4[%c32, %c0_14], %13 {strides = array<i32>} : memref<216x768xbf16, #tpu.memory_space<vmem>>, vector<8x384xbf16>,
    %c0_15 = arith.constant 0 : index
    %c0_16 = arith.constant 0 : index
    %c121 = arith.constant 121 : index
    %15 = vector.load %arg1[%c0_15, %c0_16, %c121] : memref<2x8x624xbf16, #tpu.memory_space<vmem>>, vector<1x8x384xbf16>
    %16 = vector.shape_cast %15 : vector<1x8x384xbf16> to vector<8x384xbf16>
    %c40 = arith.constant 40 : index
    %c0_17 = arith.constant 0 : index
    %17 = vector.load %arg4[%c40, %c0_17] : memref<216x768xbf16, #tpu.memory_space<vmem>>, vector<8x384xbf16>
    tpu.vector_store %arg4[%c40, %c0_17], %16 {strides = array<i32>} : memref<216x768xbf16, #tpu.memory_space<vmem>>, vector<8x384xbf16>,
    %c0_18 = arith.constant 0 : index
    %c0_19 = arith.constant 0 : index
    %c143 = arith.constant 143 : index
    %18 = vector.load %arg1[%c0_18, %c0_19, %c143] : memref<2x8x624xbf16, #tpu.memory_space<vmem>>, vector<1x8x384xbf16>
    %19 = vector.shape_cast %18 : vector<1x8x384xbf16> to vector<8x384xbf16>
    %c48 = arith.constant 48 : index
    %c0_20 = arith.constant 0 : index
    %20 = vector.load %arg4[%c48, %c0_20] : memref<216x768xbf16, #tpu.memory_space<vmem>>, vector<8x384xbf16>
    tpu.vector_store %arg4[%c48, %c0_20], %19 {strides = array<i32>} : memref<216x768xbf16, #tpu.memory_space<vmem>>, vector<8x384xbf16>,
    %c0_21 = arith.constant 0 : index
    %c0_22 = arith.constant 0 : index
    %c144 = arith.constant 144 : index
    %21 = vector.load %arg1[%c0_21, %c0_22, %c144] : memref<2x8x624xbf16, #tpu.memory_space<vmem>>, vector<1x8x384xbf16>
    %22 = vector.shape_cast %21 : vector<1x8x384xbf16> to vector<8x384xbf16>
    %c56 = arith.constant 56 : index
    %c0_23 = arith.constant 0 : index
    %23 = vector.load %arg4[%c56, %c0_23] : memref<216x768xbf16, #tpu.memory_space<vmem>>, vector<8x384xbf16>
    tpu.vector_store %arg4[%c56, %c0_23], %22 {strides = array<i32>} : memref<216x768xbf16, #tpu.memory_space<vmem>>, vector<8x384xbf16>,
    %c0_24 = arith.constant 0 : index
    %c0_25 = arith.constant 0 : index
    %c145 = arith.constant 145 : index
    %24 = vector.load %arg1[%c0_24, %c0_25, %c145] : memref<2x8x624xbf16, #tpu.memory_space<vmem>>, vector<1x8x384xbf16>
    %25 = vector.shape_cast %24 : vector<1x8x384xbf16> to vector<8x384xbf16>
    %c64 = arith.constant 64 : index
    %c0_26 = arith.constant 0 : index
    %26 = vector.load %arg4[%c64, %c0_26] : memref<216x768xbf16, #tpu.memory_space<vmem>>, vector<8x384xbf16>
    tpu.vector_store %arg4[%c64, %c0_26], %25 {strides = array<i32>} : memref<216x768xbf16, #tpu.memory_space<vmem>>, vector<8x384xbf16>,
    %c0_27 = arith.constant 0 : index
    %c0_28 = arith.constant 0 : index
    %c70 = arith.constant 70 : index
    %27 = vector.load %arg1[%c0_27, %c0_28, %c70] : memref<2x8x624xbf16, #tpu.memory_space<vmem>>, vector<1x8x384xbf16>
    %28 = vector.shape_cast %27 : vector<1x8x384xbf16> to vector<8x384xbf16>
    %c72 = arith.constant 72 : index
    %c0_29 = arith.constant 0 : index
    %29 = vector.load %arg4[%c72, %c0_29] : memref<216x768xbf16, #tpu.memory_space<vmem>>, vector<8x384xbf16>
    tpu.vector_store %arg4[%c72, %c0_29], %28 {strides = array<i32>} : memref<216x768xbf16, #tpu.memory_space<vmem>>, vector<8x384xbf16>,
    %c0_30 = arith.constant 0 : index
    %c0_31 = arith.constant 0 : index
    %c72_32 = arith.constant 72 : index
    %30 = vector.load %arg1[%c0_30, %c0_31, %c72_32] : memref<2x8x624xbf16, #tpu.memory_space<vmem>>, vector<1x8x384xbf16>
    %31 = vector.shape_cast %30 : vector<1x8x384xbf16> to vector<8x384xbf16>
    %c80 = arith.constant 80 : index
    %c0_33 = arith.constant 0 : index
    %32 = vector.load %arg4[%c80, %c0_33] : memref<216x768xbf16, #tpu.memory_space<vmem>>, vector<8x384xbf16>
    tpu.vector_store %arg4[%c80, %c0_33], %31 {strides = array<i32>} : memref<216x768xbf16, #tpu.memory_space<vmem>>, vector<8x384xbf16>,
    %c0_34 = arith.constant 0 : index
    %c0_35 = arith.constant 0 : index
    %c74 = arith.constant 74 : index
    %33 = vector.load %arg1[%c0_34, %c0_35, %c74] : memref<2x8x624xbf16, #tpu.memory_space<vmem>>, vector<1x8x384xbf16>
    %34 = vector.shape_cast %33 : vector<1x8x384xbf16> to vector<8x384xbf16>
    %c88 = arith.constant 88 : index
    %c0_36 = arith.constant 0 : index
    %35 = vector.load %arg4[%c88, %c0_36] : memref<216x768xbf16, #tpu.memory_space<vmem>>, vector<8x384xbf16>
    tpu.vector_store %arg4[%c88, %c0_36], %34 {strides = array<i32>} : memref<216x768xbf16, #tpu.memory_space<vmem>>, vector<8x384xbf16>,
    %c0_37 = arith.constant 0 : index
    %c0_38 = arith.constant 0 : index
    %c118 = arith.constant 118 : index
    %36 = vector.load %arg1[%c0_37, %c0_38, %c118] : memref<2x8x624xbf16, #tpu.memory_space<vmem>>, vector<1x8x384xbf16>
    %37 = vector.shape_cast %36 : vector<1x8x384xbf16> to vector<8x384xbf16>
    %c96_39 = arith.constant 96 : index
    %c0_40 = arith.constant 0 : index
    %38 = vector.load %arg4[%c96_39, %c0_40] : memref<216x768xbf16, #tpu.memory_space<vmem>>, vector<8x384xbf16>
    tpu.vector_store %arg4[%c96_39, %c0_40], %37 {strides = array<i32>} : memref<216x768xbf16, #tpu.memory_space<vmem>>, vector<8x384xbf16>,
    %c0_41 = arith.constant 0 : index
    %c0_42 = arith.constant 0 : index
    %c120_43 = arith.constant 120 : index
    %39 = vector.load %arg1[%c0_41, %c0_42, %c120_43] : memref<2x8x624xbf16, #tpu.memory_space<vmem>>, vector<1x8x384xbf16>
    %40 = vector.shape_cast %39 : vector<1x8x384xbf16> to vector<8x384xbf16>
    %c104 = arith.constant 104 : index
    %c0_44 = arith.constant 0 : index
    %41 = vector.load %arg4[%c104, %c0_44] : memref<216x768xbf16, #tpu.memory_space<vmem>>, vector<8x384xbf16>
    tpu.vector_store %arg4[%c104, %c0_44], %40 {strides = array<i32>} : memref<216x768xbf16, #tpu.memory_space<vmem>>, vector<8x384xbf16>,
    %c0_45 = arith.constant 0 : index
    %c0_46 = arith.constant 0 : index
    %c122 = arith.constant 122 : index
    %42 = vector.load %arg1[%c0_45, %c0_46, %c122] : memref<2x8x624xbf16, #tpu.memory_space<vmem>>, vector<1x8x384xbf16>
    %43 = vector.shape_cast %42 : vector<1x8x384xbf16> to vector<8x384xbf16>
    %c112 = arith.constant 112 : index
    %c0_47 = arith.constant 0 : index
    %44 = vector.load %arg4[%c112, %c0_47] : memref<216x768xbf16, #tpu.memory_space<vmem>>, vector<8x384xbf16>
    tpu.vector_store %arg4[%c112, %c0_47], %43 {strides = array<i32>} : memref<216x768xbf16, #tpu.memory_space<vmem>>, vector<8x384xbf16>,
    %c0_48 = arith.constant 0 : index
    %c0_49 = arith.constant 0 : index
    %c166 = arith.constant 166 : index
    %45 = vector.load %arg1[%c0_48, %c0_49, %c166] : memref<2x8x624xbf16, #tpu.memory_space<vmem>>, vector<1x8x384xbf16>
    %46 = vector.shape_cast %45 : vector<1x8x384xbf16> to vector<8x384xbf16>
    %c120_50 = arith.constant 120 : index
    %c0_51 = arith.constant 0 : index
    %47 = vector.load %arg4[%c120_50, %c0_51] : memref<216x768xbf16, #tpu.memory_space<vmem>>, vector<8x384xbf16>
    tpu.vector_store %arg4[%c120_50, %c0_51], %46 {strides = array<i32>} : memref<216x768xbf16, #tpu.memory_space<vmem>>, vector<8x384xbf16>,
    %c0_52 = arith.constant 0 : index
    %c0_53 = arith.constant 0 : index
    %c168 = arith.constant 168 : index
    %48 = vector.load %arg1[%c0_52, %c0_53, %c168] : memref<2x8x624xbf16, #tpu.memory_space<vmem>>, vector<1x8x384xbf16>
    %49 = vector.shape_cast %48 : vector<1x8x384xbf16> to vector<8x384xbf16>
    %c128 = arith.constant 128 : index
    %c0_54 = arith.constant 0 : index
    %50 = vector.load %arg4[%c128, %c0_54] : memref<216x768xbf16, #tpu.memory_space<vmem>>, vector<8x384xbf16>
    tpu.vector_store %arg4[%c128, %c0_54], %49 {strides = array<i32>} : memref<216x768xbf16, #tpu.memory_space<vmem>>, vector<8x384xbf16>,
    %c0_55 = arith.constant 0 : index
    %c0_56 = arith.constant 0 : index
    %c170 = arith.constant 170 : index
    %51 = vector.load %arg1[%c0_55, %c0_56, %c170] : memref<2x8x624xbf16, #tpu.memory_space<vmem>>, vector<1x8x384xbf16>
    %52 = vector.shape_cast %51 : vector<1x8x384xbf16> to vector<8x384xbf16>
    %c136 = arith.constant 136 : index
    %c0_57 = arith.constant 0 : index
    %53 = vector.load %arg4[%c136, %c0_57] : memref<216x768xbf16, #tpu.memory_space<vmem>>, vector<8x384xbf16>
    tpu.vector_store %arg4[%c136, %c0_57], %52 {strides = array<i32>} : memref<216x768xbf16, #tpu.memory_space<vmem>>, vector<8x384xbf16>,
    %c0_58 = arith.constant 0 : index
    %c0_59 = arith.constant 0 : index
    %c20 = arith.constant 20 : index
    %54 = vector.load %arg1[%c0_58, %c0_59, %c20] : memref<2x8x624xbf16, #tpu.memory_space<vmem>>, vector<1x8x384xbf16>
    %55 = vector.shape_cast %54 : vector<1x8x384xbf16> to vector<8x384xbf16>
    %c144_60 = arith.constant 144 : index
    %c0_61 = arith.constant 0 : index
    %56 = vector.load %arg4[%c144_60, %c0_61] : memref<216x768xbf16, #tpu.memory_space<vmem>>, vector<8x384xbf16>
    tpu.vector_store %arg4[%c144_60, %c0_61], %55 {strides = array<i32>} : memref<216x768xbf16, #tpu.memory_space<vmem>>, vector<8x384xbf16>,
    %c0_62 = arith.constant 0 : index
    %c0_63 = arith.constant 0 : index
    %c24_64 = arith.constant 24 : index
    %57 = vector.load %arg1[%c0_62, %c0_63, %c24_64] : memref<2x8x624xbf16, #tpu.memory_space<vmem>>, vector<1x8x384xbf16>
    %58 = vector.shape_cast %57 : vector<1x8x384xbf16> to vector<8x384xbf16>
    %c152 = arith.constant 152 : index
    %c0_65 = arith.constant 0 : index
    %59 = vector.load %arg4[%c152, %c0_65] : memref<216x768xbf16, #tpu.memory_space<vmem>>, vector<8x384xbf16>
    tpu.vector_store %arg4[%c152, %c0_65], %58 {strides = array<i32>} : memref<216x768xbf16, #tpu.memory_space<vmem>>, vector<8x384xbf16>,
    %c0_66 = arith.constant 0 : index
    %c0_67 = arith.constant 0 : index
    %c28 = arith.constant 28 : index
    %60 = vector.load %arg1[%c0_66, %c0_67, %c28] : memref<2x8x624xbf16, #tpu.memory_space<vmem>>, vector<1x8x384xbf16>
    %61 = vector.shape_cast %60 : vector<1x8x384xbf16> to vector<8x384xbf16>
    %c160 = arith.constant 160 : index
    %c0_68 = arith.constant 0 : index
    %62 = vector.load %arg4[%c160, %c0_68] : memref<216x768xbf16, #tpu.memory_space<vmem>>, vector<8x384xbf16>
    tpu.vector_store %arg4[%c160, %c0_68], %61 {strides = array<i32>} : memref<216x768xbf16, #tpu.memory_space<vmem>>, vector<8x384xbf16>,
    %c0_69 = arith.constant 0 : index
    %c0_70 = arith.constant 0 : index
    %c116 = arith.constant 116 : index
    %63 = vector.load %arg1[%c0_69, %c0_70, %c116] : memref<2x8x624xbf16, #tpu.memory_space<vmem>>, vector<1x8x384xbf16>
    %64 = vector.shape_cast %63 : vector<1x8x384xbf16> to vector<8x384xbf16>
    %c168_71 = arith.constant 168 : index
    %c0_72 = arith.constant 0 : index
    %65 = vector.load %arg4[%c168_71, %c0_72] : memref<216x768xbf16, #tpu.memory_space<vmem>>, vector<8x384xbf16>
    tpu.vector_store %arg4[%c168_71, %c0_72], %64 {strides = array<i32>} : memref<216x768xbf16, #tpu.memory_space<vmem>>, vector<8x384xbf16>,
    %c0_73 = arith.constant 0 : index
    %c0_74 = arith.constant 0 : index
    %c120_75 = arith.constant 120 : index
    %66 = vector.load %arg1[%c0_73, %c0_74, %c120_75] : memref<2x8x624xbf16, #tpu.memory_space<vmem>>, vector<1x8x384xbf16>
    %67 = vector.shape_cast %66 : vector<1x8x384xbf16> to vector<8x384xbf16>
    %c176 = arith.constant 176 : index
    %c0_76 = arith.constant 0 : index
    %68 = vector.load %arg4[%c176, %c0_76] : memref<216x768xbf16, #tpu.memory_space<vmem>>, vector<8x384xbf16>
    tpu.vector_store %arg4[%c176, %c0_76], %67 {strides = array<i32>} : memref<216x768xbf16, #tpu.memory_space<vmem>>, vector<8x384xbf16>,
    %c0_77 = arith.constant 0 : index
    %c0_78 = arith.constant 0 : index
    %c124 = arith.constant 124 : index
    %69 = vector.load %arg1[%c0_77, %c0_78, %c124] : memref<2x8x624xbf16, #tpu.memory_space<vmem>>, vector<1x8x384xbf16>
    %70 = vector.shape_cast %69 : vector<1x8x384xbf16> to vector<8x384xbf16>
    %c184 = arith.constant 184 : index
    %c0_79 = arith.constant 0 : index
    %71 = vector.load %arg4[%c184, %c0_79] : memref<216x768xbf16, #tpu.memory_space<vmem>>, vector<8x384xbf16>
    tpu.vector_store %arg4[%c184, %c0_79], %70 {strides = array<i32>} : memref<216x768xbf16, #tpu.memory_space<vmem>>, vector<8x384xbf16>,
    %c0_80 = arith.constant 0 : index
    %c0_81 = arith.constant 0 : index
    %c212 = arith.constant 212 : index
    %72 = vector.load %arg1[%c0_80, %c0_81, %c212] : memref<2x8x624xbf16, #tpu.memory_space<vmem>>, vector<1x8x384xbf16>
    %73 = vector.shape_cast %72 : vector<1x8x384xbf16> to vector<8x384xbf16>
    %c192 = arith.constant 192 : index
    %c0_82 = arith.constant 0 : index
    %74 = vector.load %arg4[%c192, %c0_82] : memref<216x768xbf16, #tpu.memory_space<vmem>>, vector<8x384xbf16>
    tpu.vector_store %arg4[%c192, %c0_82], %73 {strides = array<i32>} : memref<216x768xbf16, #tpu.memory_space<vmem>>, vector<8x384xbf16>,
    %c0_83 = arith.constant 0 : index
    %c0_84 = arith.constant 0 : index
    %c216 = arith.constant 216 : index
    %75 = vector.load %arg1[%c0_83, %c0_84, %c216] : memref<2x8x624xbf16, #tpu.memory_space<vmem>>, vector<1x8x384xbf16>
    %76 = vector.shape_cast %75 : vector<1x8x384xbf16> to vector<8x384xbf16>
    %c200 = arith.constant 200 : index
    %c0_85 = arith.constant 0 : index
    %77 = vector.load %arg4[%c200, %c0_85] : memref<216x768xbf16, #tpu.memory_space<vmem>>, vector<8x384xbf16>
    tpu.vector_store %arg4[%c200, %c0_85], %76 {strides = array<i32>} : memref<216x768xbf16, #tpu.memory_space<vmem>>, vector<8x384xbf16>,
    %c0_86 = arith.constant 0 : index
    %c0_87 = arith.constant 0 : index
    %c220 = arith.constant 220 : index
    %78 = vector.load %arg1[%c0_86, %c0_87, %c220] : memref<2x8x624xbf16, #tpu.memory_space<vmem>>, vector<1x8x384xbf16>
    %79 = vector.shape_cast %78 : vector<1x8x384xbf16> to vector<8x384xbf16>
    %c208 = arith.constant 208 : index
    %c0_88 = arith.constant 0 : index
    %80 = vector.load %arg4[%c208, %c0_88] : memref<216x768xbf16, #tpu.memory_space<vmem>>, vector<8x384xbf16>
    tpu.vector_store %arg4[%c208, %c0_88], %79 {strides = array<i32>} : memref<216x768xbf16, #tpu.memory_space<vmem>>, vector<8x384xbf16>,
    %c1 = arith.constant 1 : index
    %c0_89 = arith.constant 0 : index
    %c95_90 = arith.constant 95 : index
    %81 = vector.load %arg1[%c1, %c0_89, %c95_90] : memref<2x8x624xbf16, #tpu.memory_space<vmem>>, vector<1x8x384xbf16>
    %82 = vector.shape_cast %81 : vector<1x8x384xbf16> to vector<8x384xbf16>
    %c0_91 = arith.constant 0 : index
    %c384 = arith.constant 384 : index
    %83 = vector.load %arg4[%c0_91, %c384] : memref<216x768xbf16, #tpu.memory_space<vmem>>, vector<8x384xbf16>
    tpu.vector_store %arg4[%c0_91, %c384], %82 {strides = array<i32>} : memref<216x768xbf16, #tpu.memory_space<vmem>>, vector<8x384xbf16>,
    %c1_92 = arith.constant 1 : index
    %c0_93 = arith.constant 0 : index
    %c96_94 = arith.constant 96 : index
    %84 = vector.load %arg1[%c1_92, %c0_93, %c96_94] : memref<2x8x624xbf16, #tpu.memory_space<vmem>>, vector<1x8x384xbf16>
    %85 = vector.shape_cast %84 : vector<1x8x384xbf16> to vector<8x384xbf16>
    %c8_95 = arith.constant 8 : index
    %c384_96 = arith.constant 384 : index
    %86 = vector.load %arg4[%c8_95, %c384_96] : memref<216x768xbf16, #tpu.memory_space<vmem>>, vector<8x384xbf16>
    tpu.vector_store %arg4[%c8_95, %c384_96], %85 {strides = array<i32>} : memref<216x768xbf16, #tpu.memory_space<vmem>>, vector<8x384xbf16>,
    %c1_97 = arith.constant 1 : index
    %c0_98 = arith.constant 0 : index
    %c97_99 = arith.constant 97 : index
    %87 = vector.load %arg1[%c1_97, %c0_98, %c97_99] : memref<2x8x624xbf16, #tpu.memory_space<vmem>>, vector<1x8x384xbf16>
    %88 = vector.shape_cast %87 : vector<1x8x384xbf16> to vector<8x384xbf16>
    %c16_100 = arith.constant 16 : index
    %c384_101 = arith.constant 384 : index
    %89 = vector.load %arg4[%c16_100, %c384_101] : memref<216x768xbf16, #tpu.memory_space<vmem>>, vector<8x384xbf16>
    tpu.vector_store %arg4[%c16_100, %c384_101], %88 {strides = array<i32>} : memref<216x768xbf16, #tpu.memory_space<vmem>>, vector<8x384xbf16>,
    %c1_102 = arith.constant 1 : index
    %c0_103 = arith.constant 0 : index
    %c119_104 = arith.constant 119 : index
    %90 = vector.load %arg1[%c1_102, %c0_103, %c119_104] : memref<2x8x624xbf16, #tpu.memory_space<vmem>>, vector<1x8x384xbf16>
    %91 = vector.shape_cast %90 : vector<1x8x384xbf16> to vector<8x384xbf16>
    %c24_105 = arith.constant 24 : index
    %c384_106 = arith.constant 384 : index
    %92 = vector.load %arg4[%c24_105, %c384_106] : memref<216x768xbf16, #tpu.memory_space<vmem>>, vector<8x384xbf16>
    tpu.vector_store %arg4[%c24_105, %c384_106], %91 {strides = array<i32>} : memref<216x768xbf16, #tpu.memory_space<vmem>>, vector<8x384xbf16>,
    %c1_107 = arith.constant 1 : index
    %c0_108 = arith.constant 0 : index
    %c120_109 = arith.constant 120 : index
    %93 = vector.load %arg1[%c1_107, %c0_108, %c120_109] : memref<2x8x624xbf16, #tpu.memory_space<vmem>>, vector<1x8x384xbf16>
    %94 = vector.shape_cast %93 : vector<1x8x384xbf16> to vector<8x384xbf16>
    %c32_110 = arith.constant 32 : index
    %c384_111 = arith.constant 384 : index
    %95 = vector.load %arg4[%c32_110, %c384_111] : memref<216x768xbf16, #tpu.memory_space<vmem>>, vector<8x384xbf16>
    tpu.vector_store %arg4[%c32_110, %c384_111], %94 {strides = array<i32>} : memref<216x768xbf16, #tpu.memory_space<vmem>>, vector<8x384xbf16>,
    %c1_112 = arith.constant 1 : index
    %c0_113 = arith.constant 0 : index
    %c121_114 = arith.constant 121 : index
    %96 = vector.load %arg1[%c1_112, %c0_113, %c121_114] : memref<2x8x624xbf16, #tpu.memory_space<vmem>>, vector<1x8x384xbf16>
    %97 = vector.shape_cast %96 : vector<1x8x384xbf16> to vector<8x384xbf16>
    %c40_115 = arith.constant 40 : index
    %c384_116 = arith.constant 384 : index
    %98 = vector.load %arg4[%c40_115, %c384_116] : memref<216x768xbf16, #tpu.memory_space<vmem>>, vector<8x384xbf16>
    tpu.vector_store %arg4[%c40_115, %c384_116], %97 {strides = array<i32>} : memref<216x768xbf16, #tpu.memory_space<vmem>>, vector<8x384xbf16>,
    %c1_117 = arith.constant 1 : index
    %c0_118 = arith.constant 0 : index
    %c143_119 = arith.constant 143 : index
    %99 = vector.load %arg1[%c1_117, %c0_118, %c143_119] : memref<2x8x624xbf16, #tpu.memory_space<vmem>>, vector<1x8x384xbf16>
    %100 = vector.shape_cast %99 : vector<1x8x384xbf16> to vector<8x384xbf16>
    %c48_120 = arith.constant 48 : index
    %c384_121 = arith.constant 384 : index
    %101 = vector.load %arg4[%c48_120, %c384_121] : memref<216x768xbf16, #tpu.memory_space<vmem>>, vector<8x384xbf16>
    tpu.vector_store %arg4[%c48_120, %c384_121], %100 {strides = array<i32>} : memref<216x768xbf16, #tpu.memory_space<vmem>>, vector<8x384xbf16>,
    %c1_122 = arith.constant 1 : index
    %c0_123 = arith.constant 0 : index
    %c144_124 = arith.constant 144 : index
    %102 = vector.load %arg1[%c1_122, %c0_123, %c144_124] : memref<2x8x624xbf16, #tpu.memory_space<vmem>>, vector<1x8x384xbf16>
    %103 = vector.shape_cast %102 : vector<1x8x384xbf16> to vector<8x384xbf16>
    %c56_125 = arith.constant 56 : index
    %c384_126 = arith.constant 384 : index
    %104 = vector.load %arg4[%c56_125, %c384_126] : memref<216x768xbf16, #tpu.memory_space<vmem>>, vector<8x384xbf16>
    tpu.vector_store %arg4[%c56_125, %c384_126], %103 {strides = array<i32>} : memref<216x768xbf16, #tpu.memory_space<vmem>>, vector<8x384xbf16>,
    %c1_127 = arith.constant 1 : index
    %c0_128 = arith.constant 0 : index
    %c145_129 = arith.constant 145 : index
    %105 = vector.load %arg1[%c1_127, %c0_128, %c145_129] : memref<2x8x624xbf16, #tpu.memory_space<vmem>>, vector<1x8x384xbf16>
    %106 = vector.shape_cast %105 : vector<1x8x384xbf16> to vector<8x384xbf16>
    %c64_130 = arith.constant 64 : index
    %c384_131 = arith.constant 384 : index
    %107 = vector.load %arg4[%c64_130, %c384_131] : memref<216x768xbf16, #tpu.memory_space<vmem>>, vector<8x384xbf16>
    tpu.vector_store %arg4[%c64_130, %c384_131], %106 {strides = array<i32>} : memref<216x768xbf16, #tpu.memory_space<vmem>>, vector<8x384xbf16>,
    %c1_132 = arith.constant 1 : index
    %c0_133 = arith.constant 0 : index
    %c70_134 = arith.constant 70 : index
    %108 = vector.load %arg1[%c1_132, %c0_133, %c70_134] : memref<2x8x624xbf16, #tpu.memory_space<vmem>>, vector<1x8x384xbf16>
    %109 = vector.shape_cast %108 : vector<1x8x384xbf16> to vector<8x384xbf16>
    %c72_135 = arith.constant 72 : index
    %c384_136 = arith.constant 384 : index
    %110 = vector.load %arg4[%c72_135, %c384_136] : memref<216x768xbf16, #tpu.memory_space<vmem>>, vector<8x384xbf16>
    tpu.vector_store %arg4[%c72_135, %c384_136], %109 {strides = array<i32>} : memref<216x768xbf16, #tpu.memory_space<vmem>>, vector<8x384xbf16>,
    %c1_137 = arith.constant 1 : index
    %c0_138 = arith.constant 0 : index
    %c72_139 = arith.constant 72 : index
    %111 = vector.load %arg1[%c1_137, %c0_138, %c72_139] : memref<2x8x624xbf16, #tpu.memory_space<vmem>>, vector<1x8x384xbf16>
    %112 = vector.shape_cast %111 : vector<1x8x384xbf16> to vector<8x384xbf16>
    %c80_140 = arith.constant 80 : index
    %c384_141 = arith.constant 384 : index
    %113 = vector.load %arg4[%c80_140, %c384_141] : memref<216x768xbf16, #tpu.memory_space<vmem>>, vector<8x384xbf16>
    tpu.vector_store %arg4[%c80_140, %c384_141], %112 {strides = array<i32>} : memref<216x768xbf16, #tpu.memory_space<vmem>>, vector<8x384xbf16>,
    %c1_142 = arith.constant 1 : index
    %c0_143 = arith.constant 0 : index
    %c74_144 = arith.constant 74 : index
    %114 = vector.load %arg1[%c1_142, %c0_143, %c74_144] : memref<2x8x624xbf16, #tpu.memory_space<vmem>>, vector<1x8x384xbf16>
    %115 = vector.shape_cast %114 : vector<1x8x384xbf16> to vector<8x384xbf16>
    %c88_145 = arith.constant 88 : index
    %c384_146 = arith.constant 384 : index
    %116 = vector.load %arg4[%c88_145, %c384_146] : memref<216x768xbf16, #tpu.memory_space<vmem>>, vector<8x384xbf16>
    tpu.vector_store %arg4[%c88_145, %c384_146], %115 {strides = array<i32>} : memref<216x768xbf16, #tpu.memory_space<vmem>>, vector<8x384xbf16>,
    %c1_147 = arith.constant 1 : index
    %c0_148 = arith.constant 0 : index
    %c118_149 = arith.constant 118 : index
    %117 = vector.load %arg1[%c1_147, %c0_148, %c118_149] : memref<2x8x624xbf16, #tpu.memory_space<vmem>>, vector<1x8x384xbf16>
    %118 = vector.shape_cast %117 : vector<1x8x384xbf16> to vector<8x384xbf16>
    %c96_150 = arith.constant 96 : index
    %c384_151 = arith.constant 384 : index
    %119 = vector.load %arg4[%c96_150, %c384_151] : memref<216x768xbf16, #tpu.memory_space<vmem>>, vector<8x384xbf16>
    tpu.vector_store %arg4[%c96_150, %c384_151], %118 {strides = array<i32>} : memref<216x768xbf16, #tpu.memory_space<vmem>>, vector<8x384xbf16>,
    %c1_152 = arith.constant 1 : index
    %c0_153 = arith.constant 0 : index
    %c120_154 = arith.constant 120 : index
    %120 = vector.load %arg1[%c1_152, %c0_153, %c120_154] : memref<2x8x624xbf16, #tpu.memory_space<vmem>>, vector<1x8x384xbf16>
    %121 = vector.shape_cast %120 : vector<1x8x384xbf16> to vector<8x384xbf16>
    %c104_155 = arith.constant 104 : index
    %c384_156 = arith.constant 384 : index
    %122 = vector.load %arg4[%c104_155, %c384_156] : memref<216x768xbf16, #tpu.memory_space<vmem>>, vector<8x384xbf16>
    tpu.vector_store %arg4[%c104_155, %c384_156], %121 {strides = array<i32>} : memref<216x768xbf16, #tpu.memory_space<vmem>>, vector<8x384xbf16>,
    %c1_157 = arith.constant 1 : index
    %c0_158 = arith.constant 0 : index
    %c122_159 = arith.constant 122 : index
    %123 = vector.load %arg1[%c1_157, %c0_158, %c122_159] : memref<2x8x624xbf16, #tpu.memory_space<vmem>>, vector<1x8x384xbf16>
    %124 = vector.shape_cast %123 : vector<1x8x384xbf16> to vector<8x384xbf16>
    %c112_160 = arith.constant 112 : index
    %c384_161 = arith.constant 384 : index
    %125 = vector.load %arg4[%c112_160, %c384_161] : memref<216x768xbf16, #tpu.memory_space<vmem>>, vector<8x384xbf16>
    tpu.vector_store %arg4[%c112_160, %c384_161], %124 {strides = array<i32>} : memref<216x768xbf16, #tpu.memory_space<vmem>>, vector<8x384xbf16>,
    %c1_162 = arith.constant 1 : index
    %c0_163 = arith.constant 0 : index
    %c166_164 = arith.constant 166 : index
    %126 = vector.load %arg1[%c1_162, %c0_163, %c166_164] : memref<2x8x624xbf16, #tpu.memory_space<vmem>>, vector<1x8x384xbf16>
    %127 = vector.shape_cast %126 : vector<1x8x384xbf16> to vector<8x384xbf16>
    %c120_165 = arith.constant 120 : index
    %c384_166 = arith.constant 384 : index
    %128 = vector.load %arg4[%c120_165, %c384_166] : memref<216x768xbf16, #tpu.memory_space<vmem>>, vector<8x384xbf16>
    tpu.vector_store %arg4[%c120_165, %c384_166], %127 {strides = array<i32>} : memref<216x768xbf16, #tpu.memory_space<vmem>>, vector<8x384xbf16>,
    %c1_167 = arith.constant 1 : index
    %c0_168 = arith.constant 0 : index
    %c168_169 = arith.constant 168 : index
    %129 = vector.load %arg1[%c1_167, %c0_168, %c168_169] : memref<2x8x624xbf16, #tpu.memory_space<vmem>>, vector<1x8x384xbf16>
    %130 = vector.shape_cast %129 : vector<1x8x384xbf16> to vector<8x384xbf16>
    %c128_170 = arith.constant 128 : index
    %c384_171 = arith.constant 384 : index
    %131 = vector.load %arg4[%c128_170, %c384_171] : memref<216x768xbf16, #tpu.memory_space<vmem>>, vector<8x384xbf16>
    tpu.vector_store %arg4[%c128_170, %c384_171], %130 {strides = array<i32>} : memref<216x768xbf16, #tpu.memory_space<vmem>>, vector<8x384xbf16>,
    %c1_172 = arith.constant 1 : index
    %c0_173 = arith.constant 0 : index
    %c170_174 = arith.constant 170 : index
    %132 = vector.load %arg1[%c1_172, %c0_173, %c170_174] : memref<2x8x624xbf16, #tpu.memory_space<vmem>>, vector<1x8x384xbf16>
    %133 = vector.shape_cast %132 : vector<1x8x384xbf16> to vector<8x384xbf16>
    %c136_175 = arith.constant 136 : index
    %c384_176 = arith.constant 384 : index
    %134 = vector.load %arg4[%c136_175, %c384_176] : memref<216x768xbf16, #tpu.memory_space<vmem>>, vector<8x384xbf16>
    tpu.vector_store %arg4[%c136_175, %c384_176], %133 {strides = array<i32>} : memref<216x768xbf16, #tpu.memory_space<vmem>>, vector<8x384xbf16>,
    %c1_177 = arith.constant 1 : index
    %c0_178 = arith.constant 0 : index
    %c20_179 = arith.constant 20 : index
    %135 = vector.load %arg1[%c1_177, %c0_178, %c20_179] : memref<2x8x624xbf16, #tpu.memory_space<vmem>>, vector<1x8x384xbf16>
    %136 = vector.shape_cast %135 : vector<1x8x384xbf16> to vector<8x384xbf16>
    %c144_180 = arith.constant 144 : index
    %c384_181 = arith.constant 384 : index
    %137 = vector.load %arg4[%c144_180, %c384_181] : memref<216x768xbf16, #tpu.memory_space<vmem>>, vector<8x384xbf16>
    tpu.vector_store %arg4[%c144_180, %c384_181], %136 {strides = array<i32>} : memref<216x768xbf16, #tpu.memory_space<vmem>>, vector<8x384xbf16>,
    %c1_182 = arith.constant 1 : index
    %c0_183 = arith.constant 0 : index
    %c24_184 = arith.constant 24 : index
    %138 = vector.load %arg1[%c1_182, %c0_183, %c24_184] : memref<2x8x624xbf16, #tpu.memory_space<vmem>>, vector<1x8x384xbf16>
    %139 = vector.shape_cast %138 : vector<1x8x384xbf16> to vector<8x384xbf16>
    %c152_185 = arith.constant 152 : index
    %c384_186 = arith.constant 384 : index
    %140 = vector.load %arg4[%c152_185, %c384_186] : memref<216x768xbf16, #tpu.memory_space<vmem>>, vector<8x384xbf16>
    tpu.vector_store %arg4[%c152_185, %c384_186], %139 {strides = array<i32>} : memref<216x768xbf16, #tpu.memory_space<vmem>>, vector<8x384xbf16>,
    %c1_187 = arith.constant 1 : index
    %c0_188 = arith.constant 0 : index
    %c28_189 = arith.constant 28 : index
    %141 = vector.load %arg1[%c1_187, %c0_188, %c28_189] : memref<2x8x624xbf16, #tpu.memory_space<vmem>>, vector<1x8x384xbf16>
    %142 = vector.shape_cast %141 : vector<1x8x384xbf16> to vector<8x384xbf16>
    %c160_190 = arith.constant 160 : index
    %c384_191 = arith.constant 384 : index
    %143 = vector.load %arg4[%c160_190, %c384_191] : memref<216x768xbf16, #tpu.memory_space<vmem>>, vector<8x384xbf16>
    tpu.vector_store %arg4[%c160_190, %c384_191], %142 {strides = array<i32>} : memref<216x768xbf16, #tpu.memory_space<vmem>>, vector<8x384xbf16>,
    %c1_192 = arith.constant 1 : index
    %c0_193 = arith.constant 0 : index
    %c116_194 = arith.constant 116 : index
    %144 = vector.load %arg1[%c1_192, %c0_193, %c116_194] : memref<2x8x624xbf16, #tpu.memory_space<vmem>>, vector<1x8x384xbf16>
    %145 = vector.shape_cast %144 : vector<1x8x384xbf16> to vector<8x384xbf16>
    %c168_195 = arith.constant 168 : index
    %c384_196 = arith.constant 384 : index
    %146 = vector.load %arg4[%c168_195, %c384_196] : memref<216x768xbf16, #tpu.memory_space<vmem>>, vector<8x384xbf16>
    tpu.vector_store %arg4[%c168_195, %c384_196], %145 {strides = array<i32>} : memref<216x768xbf16, #tpu.memory_space<vmem>>, vector<8x384xbf16>,
    %c1_197 = arith.constant 1 : index
    %c0_198 = arith.constant 0 : index
    %c120_199 = arith.constant 120 : index
    %147 = vector.load %arg1[%c1_197, %c0_198, %c120_199] : memref<2x8x624xbf16, #tpu.memory_space<vmem>>, vector<1x8x384xbf16>
    %148 = vector.shape_cast %147 : vector<1x8x384xbf16> to vector<8x384xbf16>
    %c176_200 = arith.constant 176 : index
    %c384_201 = arith.constant 384 : index
    %149 = vector.load %arg4[%c176_200, %c384_201] : memref<216x768xbf16, #tpu.memory_space<vmem>>, vector<8x384xbf16>
    tpu.vector_store %arg4[%c176_200, %c384_201], %148 {strides = array<i32>} : memref<216x768xbf16, #tpu.memory_space<vmem>>, vector<8x384xbf16>,
    %c1_202 = arith.constant 1 : index
    %c0_203 = arith.constant 0 : index
    %c124_204 = arith.constant 124 : index
    %150 = vector.load %arg1[%c1_202, %c0_203, %c124_204] : memref<2x8x624xbf16, #tpu.memory_space<vmem>>, vector<1x8x384xbf16>
    %151 = vector.shape_cast %150 : vector<1x8x384xbf16> to vector<8x384xbf16>
    %c184_205 = arith.constant 184 : index
    %c384_206 = arith.constant 384 : index
    %152 = vector.load %arg4[%c184_205, %c384_206] : memref<216x768xbf16, #tpu.memory_space<vmem>>, vector<8x384xbf16>
    tpu.vector_store %arg4[%c184_205, %c384_206], %151 {strides = array<i32>} : memref<216x768xbf16, #tpu.memory_space<vmem>>, vector<8x384xbf16>,
    %c1_207 = arith.constant 1 : index
    %c0_208 = arith.constant 0 : index
    %c212_209 = arith.constant 212 : index
    %153 = vector.load %arg1[%c1_207, %c0_208, %c212_209] : memref<2x8x624xbf16, #tpu.memory_space<vmem>>, vector<1x8x384xbf16>
    %154 = vector.shape_cast %153 : vector<1x8x384xbf16> to vector<8x384xbf16>
    %c192_210 = arith.constant 192 : index
    %c384_211 = arith.constant 384 : index
    %155 = vector.load %arg4[%c192_210, %c384_211] : memref<216x768xbf16, #tpu.memory_space<vmem>>, vector<8x384xbf16>
    tpu.vector_store %arg4[%c192_210, %c384_211], %154 {strides = array<i32>} : memref<216x768xbf16, #tpu.memory_space<vmem>>, vector<8x384xbf16>,
    %c1_212 = arith.constant 1 : index
    %c0_213 = arith.constant 0 : index
    %c216_214 = arith.constant 216 : index
    %156 = vector.load %arg1[%c1_212, %c0_213, %c216_214] : memref<2x8x624xbf16, #tpu.memory_space<vmem>>, vector<1x8x384xbf16>
    %157 = vector.shape_cast %156 : vector<1x8x384xbf16> to vector<8x384xbf16>
    %c200_215 = arith.constant 200 : index
    %c384_216 = arith.constant 384 : index
    %158 = vector.load %arg4[%c200_215, %c384_216] : memref<216x768xbf16, #tpu.memory_space<vmem>>, vector<8x384xbf16>
    tpu.vector_store %arg4[%c200_215, %c384_216], %157 {strides = array<i32>} : memref<216x768xbf16, #tpu.memory_space<vmem>>, vector<8x384xbf16>,
    %c1_217 = arith.constant 1 : index
    %c0_218 = arith.constant 0 : index
    %c220_219 = arith.constant 220 : index
    %159 = vector.load %arg1[%c1_217, %c0_218, %c220_219] : memref<2x8x624xbf16, #tpu.memory_space<vmem>>, vector<1x8x384xbf16>
    %160 = vector.shape_cast %159 : vector<1x8x384xbf16> to vector<8x384xbf16>
    %c208_220 = arith.constant 208 : index
    %c384_221 = arith.constant 384 : index
    %161 = vector.load %arg4[%c208_220, %c384_221] : memref<216x768xbf16, #tpu.memory_space<vmem>>, vector<8x384xbf16>
    tpu.vector_store %arg4[%c208_220, %c384_221], %160 {strides = array<i32>} : memref<216x768xbf16, #tpu.memory_space<vmem>>, vector<8x384xbf16>,
    %c0_222 = arith.constant 0 : index
    %c0_223 = arith.constant 0 : index
    %162 = vector.load %arg2[%c0_222, %c0_223] : memref<8x216xbf16, #tpu.memory_space<vmem>>, vector<8x216xbf16>
    %c0_224 = arith.constant 0 : index
    %c0_225 = arith.constant 0 : index
    %163 = vector.load %arg4[%c0_224, %c0_225] : memref<216x768xbf16, #tpu.memory_space<vmem>>, vector<216x768xbf16>
    %cst = arith.constant dense<0.000000e+00> : vector<8x768xf32>
    %164 = tpu.matmul %162, %163, %cst {dimension_numbers = #tpu.dot_dimension_numbers<[1], [0], [0], [1], [0, 0, 1, 1], [], []>} : vector<8x216xbf16>, vector<216x768xbf16>, vector<8x768xf32> -> vector<8x768xf32>
    %165 = vector.extract_strided_slice %164 {offsets = [0, 0], sizes = [8, 384], strides = [1, 1]} : vector<8x768xf32> to vector<8x384xf32>
    %c0_226 = arith.constant 0 : index
    %c0_227 = arith.constant 0 : index
    %c0_228 = arith.constant 0 : index
    %166 = vector.load %arg3[%c0_226, %c0_227, %c0_228] : memref<2x8x384xf32, #tpu.memory_space<vmem>>, vector<1x8x384xf32>
    %167 = vector.shape_cast %166 : vector<1x8x384xf32> to vector<8x384xf32>
    %168 = vector.shape_cast %165 : vector<8x384xf32> to vector<1x8x384xf32>
    tpu.vector_store %arg3[%c0_226, %c0_227, %c0_228], %168 {strides = array<i32>} : memref<2x8x384xf32, #tpu.memory_space<vmem>>, vector<1x8x384xf32>,
    %169 = vector.extract_strided_slice %164 {offsets = [0, 384], sizes = [8, 384], strides = [1, 1]} : vector<8x768xf32> to vector<8x384xf32>
    %c1_229 = arith.constant 1 : index
    %c0_230 = arith.constant 0 : index
    %c0_231 = arith.constant 0 : index
    %170 = vector.load %arg3[%c1_229, %c0_230, %c0_231] : memref<2x8x384xf32, #tpu.memory_space<vmem>>, vector<1x8x384xf32>
    %171 = vector.shape_cast %170 : vector<1x8x384xf32> to vector<8x384xf32>
    %172 = vector.shape_cast %169 : vector<8x384xf32> to vector<1x8x384xf32>
    tpu.vector_store %arg3[%c1_229, %c0_230, %c0_231], %172 {strides = array<i32>} : memref<2x8x384xf32, #tpu.memory_space<vmem>>, vector<1x8x384xf32>,
    return
  }
  func.func @transform_0(%arg0: i32) -> (i32, i32, i32) {
    %c0_i32 = arith.constant 0 : i32
    %c0_i32_0 = arith.constant 0 : i32
    %c0_i32_1 = arith.constant 0 : i32
    return %arg0, %c0_i32, %c0_i32_0 : i32, i32, i32
  }
  func.func @transform_1(%arg0: i32) -> (i32, i32) {
    %c0_i32 = arith.constant 0 : i32
    %c0_i32_0 = arith.constant 0 : i32
    %c0_i32_1 = arith.constant 0 : i32
    return %c0_i32, %c0_i32_0 : i32, i32
  }
  func.func @transform_2(%arg0: i32) -> (i32, i32, i32) {
    %c0_i32 = arith.constant 0 : i32
    %c0_i32_0 = arith.constant 0 : i32
    %c0_i32_1 = arith.constant 0 : i32
    return %arg0, %c0_i32, %c0_i32_0 : i32, i32, i32
  }
}

</mosaic_0001>

<bundles_post_ra>
// kernel: tpu_custom_call.1
= control target key start
LH: loop header
LB: loop body
LE: loop exit
PB: predicated region body
PF: predicated region fallthrough
CT: control target
= control target key end

     0   :  { %7 = vsyncpa [#allocation4], 0  ;;  %s2843_s0 = inlined_call_operand.hbm [shape: bf16[2,8,624], index: 0, kind: input, shape index: {}]   ;;  %s2844_s1 = inlined_call_operand.hbm [shape: bf16[8,216], index: 1, kind: input, shape index: {}]   ;;  %s2845_s2 = inlined_call_operand.hbm [shape: f32[2,8,384], index: 2, kind: output, shape index: {}]  }
   0x1   :  { %8 = vsyncpa [#allocation7], 0 }
   0x2   :  { %9 = vsyncpa [#allocation5], 0  ;;  %s14_s11 = sshll.u32 %s2843_s0, 4  ;;  %s2193_s12 = smov [#allocation3]   ;;  %s15_s11 = int_to_ptr.hbm [resolvable:$true] %s14_s11 }
   0x3   :  { %s16_s13 = sshll.u32 %s2193_s12, 4  ;;  %s28_s16 = sshll.u32 %s2844_s1, 4  ;;  %s17_s13 = int_to_ptr.vmem [resolvable:$true] %s16_s13  ;;  %s29_s16 = int_to_ptr.hbm [resolvable:$true] %s28_s16 }
   0x4   :  { %s2194_s17 = smov 320   ;;  %s2195_s18 = smov 20  }
   0x5   :  { %22 = dma.hbm_to_vmem [thread:$0]  %s15_s11, 640, %s17_s13, [#allocation4], %s2194_s17, %s2194_s17, %s2195_s18  }
   0x6   :  { %s2196_s19 = smov [#allocation6]  }
   0x7   :  { %s30_s20 = sshll.u32 %s2196_s19, 4  ;;  %s31_s20 = int_to_ptr.vmem [resolvable:$true] %s30_s20 }
   0x8   :  { %33 = dma.hbm_to_vmem [thread:$0]  %s29_s16, 128, %s31_s20, [#allocation7]  }
   0x9   :  { %2187 = dma.done.wait [#allocation4], 640  }
   0xa   :  { %2188 = vsyncadd [#allocation4], 4294966656 }
   0xb   :  { %2189 = dma.done.wait [#allocation7], 128  }
   0xc   :  { %2190 = vsyncadd [#allocation7], 4294967168  ;;  %v2246_v0 = vld [vmem:[#allocation3] sm:$0xff]  ;;  %s2197_s0 = smov 32   ;;  %s2198_s21 = smov 33   ;;  %v2254_v1 = vld [vmem:[#allocation3 + $0x8] sm:$0xff] }
   0xd   :  { %66 = vrot.lane.b32.xlu1 %v2246_v0, %s2197_s0  ;;  %47 = vrot.lane.b32.xlu0 %v2246_v0, %s2198_s21  ;;  %s2199_s1 = smov 31   ;;  %s2200_s22 = smov 9   ;;  %v2274_v2 = vld [vmem:[#allocation3 + $0xc] sm:$0xff]  ;;  %v2276_v3 = vld [vmem:[#allocation3 + $0x4] sm:$0xff]  ;;  %vm53_vm0 = vcmask 1043456   ;;  %vm2849_vm1 = vcmask 252928  }
   0xe   :  { %84 = vrot.lane.b32.xlu2 %v2246_v0, %s2199_s1  ;;  %s2201_s23 = smov 8   ;;  %s2202_s24 = smov 7   ;;  %vm2851_vm2 = vcmask 56320   ;;  %v2349_v16 = vld [vmem:[#allocation3 + $0x18] sm:$0xff]  ;;  %v2356_v18 = vld [vmem:[#allocation3 + $0x20] sm:$0xff]  ;;  %vm2848_vm3 = vcmask 261120  }
   0xf   :  { %s2203_s25 = smov 113   ;;  %s2204_s26 = smov 112   ;;  %vm2846_vm4 = vcmask 269312   ;;  %v2365_v29 = vld [vmem:[#allocation3 + $0x1c] sm:$0xff]  ;;  %v2367_v30 = vld [vmem:[#allocation3 + $0x14] sm:$0xff]  ;;  %vm2847_vm5 = vcmask 72704  }
  0x10   :  { %s2205_s27 = smov 111   ;;  %s2206_s28 = smov 58   ;;  %vm199_vm6 = vcmask 908288   ;;  %vm127_vm7 = vcmask 64512   ;;  %vm2852_vm8 = vcmask 924672   ;;  %vm2850_vm9 = vcmask 916480  }
  0x11   :  { %s2207_s29 = smov 56   ;;  %s2208_s30 = smov 54   ;;  %vm324_vm10 = vcmask 736256   ;;  %vm217_vm11 = vcmask 474112   ;;  %vm235_vm12 = vcmask 457728   ;;  %vm521_vm13 = vcmask 293888  }
  0x12   :  { %s2209_s3 = smov 6   ;;  %s2210_s4 = smov 90   ;;  %vm306_vm14 = vcmask 48128   ;;  %vm485_vm15 = vcmask 359424  }
  0x13   :  { %s2211_s5 = smov 10   ;;  %s2212_s6 = smov 36  }
  0x14   :  { %s2213_s7 = smov 44   ;;  %s2214_s8 = smov 40  }
  0x15   :  { %68 = vrot.lane.b32.xlu1 %v2254_v1, %s2197_s0  ;;  %49 = vrot.lane.b32.xlu0 %v2254_v1, %s2198_s21  ;;  %s2215_s9 = smov 4   ;;  %s2216_s10 = smov 100  }
  0x16   :  { %86 = vrot.lane.b32.xlu2 %v2254_v1, %s2199_s1  ;;  %s2217_s11 = smov 12   ;;  %s2218_s12 = smov 108  }
  0x17   :  { %s2219_s13 = smov 104   ;;  %s2220_s14 = smov 88  }
  0x18   :  { %s2221_s15 = smov 86   ;;  %s2222_s16 = smov [#allocation8]  }
  0x19   :  { %s1671_s17 = sshll.u32 %s2222_s16, 4  ;;  %s1673_s20 = sshll.u32 %s2845_s2, 4  ;;  %s1672_s17 = int_to_ptr.vmem [resolvable:$true] %s1671_s17  ;;  %s1674_s20 = int_to_ptr.hbm [resolvable:$true] %s1673_s20 }
  0x1d   :  { %104 = vrot.lane.b32.xlu1 %v2254_v1, %s2200_s22  ;;  %102 = vrot.lane.b32.xlu0 %v2246_v0, %s2200_s22 }
  0x1e   :  { %120 = vrot.lane.b32.xlu2 %v2246_v0, %s2201_s23 }
  0x25   :  { %138 = vrot.lane.b32.xlu1 %v2246_v0, %s2202_s24  ;;  %122 = vrot.lane.b32.xlu0 %v2254_v1, %s2201_s23 }
  0x26   :  { %140 = vrot.lane.b32.xlu2 %v2254_v1, %s2202_s24 }
  0x2d   :  { %158 = vrot.lane.b32.xlu1 %v2274_v2, %s2203_s25  ;;  %156 = vrot.lane.b32.xlu0 %v2276_v3, %s2203_s25 }
  0x2e   :  { %174 = vrot.lane.b32.xlu2 %v2276_v3, %s2204_s26 }
  0x35   :  { %192 = vrot.lane.b32.xlu1 %v2276_v3, %s2205_s27  ;;  %176 = vrot.lane.b32.xlu0 %v2274_v2, %s2204_s26 }
  0x36   :  { %194 = vrot.lane.b32.xlu2 %v2274_v2, %s2205_s27 }
  0x3d   :  { %212 = vrot.lane.b32.xlu1 %v2254_v1, %s2206_s28  ;;  %210 = vrot.lane.b32.xlu0 %v2246_v0, %s2206_s28 }
  0x3e   :  { %228 = vrot.lane.b32.xlu2 %v2246_v0, %s2207_s29 }
  0x45   :  { %246 = vrot.lane.b32.xlu1 %v2246_v0, %s2208_s30  ;;  %230 = vrot.lane.b32.xlu0 %v2254_v1, %s2207_s29 }
  0x46   :  { %299 = vrot.lane.b32.xlu2 %v2246_v0, %s2209_s3 }
  0x4d   :  { %317 = vrot.lane.b32.xlu1 %v2276_v3, %s2210_s4  ;;  %301 = vrot.lane.b32.xlu0 %v2254_v1, %s2209_s3 }
  0x4e   :  { %319 = vrot.lane.b32.xlu2 %v2274_v2, %s2210_s4 }
  0x55   :  { %266 = vrot.lane.b32.xlu1 %v2254_v1, %s2211_s5  ;;  %264 = vrot.lane.b32.xlu0 %v2246_v0, %s2211_s5 }
  0x56   :  { %282 = vrot.lane.b32.xlu2 %v2246_v0, %s2201_s23 }
  0x5d   :  { %514 = vrot.lane.b32.xlu1 %v2276_v3, %s2212_s6  ;;  %284 = vrot.lane.b32.xlu0 %v2254_v1, %s2201_s23 }
  0x5e   :  { %516 = vrot.lane.b32.xlu2 %v2274_v2, %s2212_s6 }
  0x65   :  { %478 = vrot.lane.b32.xlu1 %v2276_v3, %s2213_s7  ;;  %248 = vrot.lane.b32.xlu0 %v2254_v1, %s2208_s30 }
  0x66   :  { %480 = vrot.lane.b32.xlu2 %v2274_v2, %s2213_s7 }
  0x68   :  { %v85_v4 = vpop.permute.xlu2 %84 }
  0x69   :  { %v88_v5 = vrot.slane %v85_v4, 4 }
  0x6d   :  { %498 = vrot.lane.b32.xlu1 %v2274_v2, %s2214_s8  ;;  %496 = vrot.lane.b32.xlu0 %v2276_v3, %s2214_s8 }
  0x6e   :  { %443 = vrot.lane.b32.xlu2 %v2246_v0, %s2201_s23 }
  0x70   :  { %v87_v6 = vpop.permute.xlu2 %86 }
  0x71   :  { %v89_v7 = vrot.slane %v87_v6, 4 }
  0x73   :  { %v90_v8 = vsel %vm53_vm0, %v88_v5, %v89_v7  ;;  %v93_v9 = vsel %vm2849_vm1, %v87_v6, %v89_v7 }
  0x74   :  { %v92_v10 = vsel %vm2849_vm1, %v85_v4, %v90_v8  ;;  %97 = vst [vmem:[#allocation2 + $0x38] sm:$0xf] %v93_v9  ;;  %vm503_vm1 = vcmask 326656  }
  0x75   :  { %460 = vrot.lane.b32.xlu1 %v2246_v0, %s2215_s9  ;;  %445 = vrot.lane.b32.xlu0 %v2254_v1, %s2201_s23  ;;  %96 = vst [vmem:[#allocation2 + $0x30] sm:$0xff] %v92_v10 }
  0x76   :  { %462 = vrot.lane.b32.xlu2 %v2254_v1, %s2215_s9 }
  0x78   :  { %v2341_v11 = vpop.permute.xlu2 %120 }
  0x79   :  { %v124_v46 = vrot.slane %v2341_v11, 4 }
  0x7d   :  { %409 = vrot.lane.b32.xlu1 %v2254_v1, %s2216_s10  ;;  %407 = vrot.lane.b32.xlu0 %v2246_v0, %s2216_s10 }
  0x7e   :  { %425 = vrot.lane.b32.xlu2 %v2246_v0, %s2217_s11 }
  0x7f   :  { %v67_v12 = vpop.permute.xlu1 %66  ;;  %v48_v13 = vpop.permute.xlu0 %47 }
  0x80   :  { %v141_v14 = vpop.permute.xlu2 %140  ;;  %v70_v21 = vrot.slane %v67_v12, 4  ;;  %v51_v22 = vrot.slane %v48_v13, 4 }
  0x81   :  { %v143_v15 = vrot.slane %v141_v14, 4 }
  0x83   :  { %v147_v17 = vsel %vm2851_vm2, %v141_v14, %v143_v15 }
  0x84   :  { %151 = vst [vmem:[#allocation2 + $0x80] sm:$0xf] %v147_v17 }
  0x85   :  { %975 = vrot.lane.b32.xlu1 %v2349_v16, %s2212_s6  ;;  %427 = vrot.lane.b32.xlu0 %v2254_v1, %s2217_s11 }
  0x86   :  { %977 = vrot.lane.b32.xlu2 %v2356_v18, %s2212_s6 }
  0x87   :  { %v69_v19 = vpop.permute.xlu1 %68  ;;  %v50_v20 = vpop.permute.xlu0 %49 }
  0x88   :  { %v71_v23 = vrot.slane %v69_v19, 4  ;;  %v52_v24 = vrot.slane %v50_v20, 4  ;;  %v2360_v25 = vpop.permute.xlu2 %174 }
  0x8a   :  { %v72_v26 = vsel %vm53_vm0, %v70_v21, %v71_v23  ;;  %v75_v27 = vsel %vm2848_vm3, %v69_v19, %v71_v23  ;;  %v54_v28 = vsel %vm53_vm0, %v51_v22, %v52_v24  ;;  %v57_v33 = vsel %vm2846_vm4, %v50_v20, %v52_v24 }
  0x8b   :  { %v74_v31 = vsel %vm2848_vm3, %v67_v12, %v72_v26  ;;  %79 = vst [vmem:[#allocation2 + $0x20] sm:$0xf] %v75_v27  ;;  %v56_v32 = vsel %vm2846_vm4, %v48_v13, %v54_v28  ;;  %vm271_vm4 = vcmask 80896   ;;  %vm253_vm3 = vcmask 441344  }
  0x8c   :  { %78 = vst [vmem:[#allocation2 + $0x18] sm:$0xff] %v74_v31 }
  0x8d   :  { %60 = vst [vmem:[#allocation2] sm:$0xff] %v56_v32  ;;  %773 = vrot.lane.b32.xlu1 %v2365_v29, %s2209_s3  ;;  %771 = vrot.lane.b32.xlu0 %v2367_v30, %s2209_s3 }
  0x8e   :  { %61 = vst [vmem:[#allocation2 + $0x8] sm:$0xf] %v57_v33  ;;  %788 = vrot.lane.b32.xlu2 %v2349_v16, %s2210_s4 }
  0x8f   :  { %v105_v34 = vpop.permute.xlu1 %104  ;;  %v103_v35 = vpop.permute.xlu0 %102 }
  0x90   :  { %v107_v36 = vrot.slane %v105_v34, 4  ;;  %v106_v37 = vrot.slane %v103_v35, 4  ;;  %v195_v38 = vpop.permute.xlu2 %194 }
  0x91   :  { %v197_v39 = vrot.slane %v195_v38, 4 }
  0x92   :  { %v111_v40 = vsel %vm2847_vm5, %v105_v34, %v107_v36  ;;  %v108_v41 = vsel %vm53_vm0, %v106_v37, %v107_v36 }
  0x93   :  { %115 = vst [vmem:[#allocation2 + $0x50] sm:$0xf] %v111_v40  ;;  %v110_v42 = vsel %vm2847_vm5, %v103_v35, %v108_v41  ;;  %v201_v43 = vsel %vm199_vm6, %v195_v38, %v197_v39  ;;  %vm467_vm5 = vcmask 31744  }
  0x94   :  { %114 = vst [vmem:[#allocation2 + $0x48] sm:$0xff] %v110_v42 }
  0x95   :  { %371 = vrot.lane.b32.xlu1 %v2246_v0, %s2218_s12  ;;  %790 = vrot.lane.b32.xlu0 %v2356_v18, %s2210_s4  ;;  %205 = vst [vmem:[#allocation2 + $0xc8] sm:$0xf] %v201_v43 }
  0x96   :  { %373 = vrot.lane.b32.xlu2 %v2254_v1, %s2218_s12 }
  0x97   :  { %v139_v44 = vpop.permute.xlu1 %138  ;;  %v123_v45 = vpop.permute.xlu0 %122 }
  0x98   :  { %v142_v47 = vrot.slane %v139_v44, 4  ;;  %v125_v48 = vrot.slane %v123_v45, 4  ;;  %v2389_v49 = vpop.permute.xlu2 %228 }
  0x9a   :  { %v144_v50 = vsel %vm53_vm0, %v142_v47, %v143_v15  ;;  %v126_v51 = vsel %vm53_vm0, %v124_v46, %v125_v48  ;;  %v129_v52 = vsel %vm127_vm7, %v123_v45, %v125_v48 }
  0x9b   :  { %v146_v53 = vsel %vm2851_vm2, %v139_v44, %v144_v50  ;;  %v128_v54 = vsel %vm127_vm7, %v2341_v11, %v126_v51  ;;  %133 = vst [vmem:[#allocation2 + $0x68] sm:$0xf] %v129_v52  ;;  %vm378_vm2 = vcmask 883712  }
  0x9c   :  { %150 = vst [vmem:[#allocation2 + $0x78] sm:$0xff] %v146_v53 }
  0x9d   :  { %132 = vst [vmem:[#allocation2 + $0x60] sm:$0xff] %v128_v54  ;;  %391 = vrot.lane.b32.xlu1 %v2254_v1, %s2219_s13  ;;  %389 = vrot.lane.b32.xlu0 %v2246_v0, %s2219_s13  ;;  %v178_v1 = vrot.slane %v2360_v25, 4 }
  0x9e   :  { %737 = vrot.lane.b32.xlu2 %v2367_v30, %s2211_s5 }
  0x9f   :  { %v159_v55 = vpop.permute.xlu1 %158  ;;  %v157_v56 = vpop.permute.xlu0 %156 }
  0xa0   :  { %v161_v57 = vrot.slane %v159_v55, 4  ;;  %v160_v58 = vrot.slane %v157_v56, 4  ;;  %v2403_v59 = vpop.permute.xlu2 %299 }
  0xa1   :  { %v303_v36 = vrot.slane %v2403_v59, 4 }
  0xa2   :  { %v165_v60 = vsel %vm2852_vm8, %v159_v55, %v161_v57  ;;  %v162_v61 = vsel %vm53_vm0, %v160_v58, %v161_v57 }
  0xa3   :  { %169 = vst [vmem:[#allocation2 + $0x98] sm:$0xf] %v165_v60  ;;  %v164_v62 = vsel %vm2852_vm8, %v157_v56, %v162_v61  ;;  %vm432_vm8 = vcmask 97280  }
  0xa4   :  { %168 = vst [vmem:[#allocation2 + $0x90] sm:$0xff] %v164_v62 }
  0xa5   :  { %754 = vrot.lane.b32.xlu1 %v2367_v30, %s2201_s23  ;;  %739 = vrot.lane.b32.xlu0 %v2365_v29, %s2211_s5 }
  0xa6   :  { %756 = vrot.lane.b32.xlu2 %v2365_v29, %s2201_s23 }
  0xa7   :  { %v193_v63 = vpop.permute.xlu1 %192  ;;  %v177_v0 = vpop.permute.xlu0 %176 }
  0xa8   :  { %v196_v4 = vrot.slane %v193_v63, 4  ;;  %v179_v5 = vrot.slane %v177_v0, 4  ;;  %v320_v6 = vpop.permute.xlu2 %319 }
  0xa9   :  { %v322_v7 = vrot.slane %v320_v6, 4 }
  0xaa   :  { %v198_v8 = vsel %vm53_vm0, %v196_v4, %v197_v39  ;;  %v180_v9 = vsel %vm53_vm0, %v178_v1, %v179_v5  ;;  %v183_v10 = vsel %vm2850_vm9, %v177_v0, %v179_v5 }
  0xab   :  { %v200_v11 = vsel %vm199_vm6, %v193_v63, %v198_v8  ;;  %v182_v12 = vsel %vm2850_vm9, %v2360_v25, %v180_v9  ;;  %187 = vst [vmem:[#allocation2 + $0xb0] sm:$0xf] %v183_v10  ;;  %v326_v13 = vsel %vm324_vm10, %v320_v6, %v322_v7  ;;  %v232_v25 = vrot.slane %v2389_v49, 4 }
  0xac   :  { %204 = vst [vmem:[#allocation2 + $0xc0] sm:$0xff] %v200_v11  ;;  %vm414_vm9 = vcmask 818176  }
  0xad   :  { %186 = vst [vmem:[#allocation2 + $0xa8] sm:$0xff] %v182_v12  ;;  %337 = vrot.lane.b32.xlu1 %v2274_v2, %s2220_s14  ;;  %335 = vrot.lane.b32.xlu0 %v2276_v3, %s2220_s14 }
  0xae   :  { %330 = vst [vmem:[#allocation2 + $0x170] sm:$0xf] %v326_v13  ;;  %353 = vrot.lane.b32.xlu2 %v2276_v3, %s2221_s15 }
  0xaf   :  { %v213_v14 = vpop.permute.xlu1 %212  ;;  %v211_v15 = vpop.permute.xlu0 %210 }
  0xb0   :  { %v215_v17 = vrot.slane %v213_v14, 4  ;;  %v214_v19 = vrot.slane %v211_v15, 4  ;;  %v2428_v20 = vpop.permute.xlu2 %282 }
  0xb1   :  { %v286_v63 = vrot.slane %v2428_v20, 4 }
  0xb2   :  { %v219_v21 = vsel %vm217_vm11, %v213_v14, %v215_v17  ;;  %v216_v22 = vsel %vm53_vm0, %v214_v19, %v215_v17 }
  0xb3   :  { %223 = vst [vmem:[#allocation2 + $0xe0] sm:$0xf] %v219_v21  ;;  %v218_v23 = vsel %vm217_vm11, %v211_v15, %v216_v22 }
  0xb4   :  { %222 = vst [vmem:[#allocation2 + $0xd8] sm:$0xff] %v218_v23 }
  0xb5   :  { %941 = vrot.lane.b32.xlu1 %v2349_v16, %s2213_s7  ;;  %355 = vrot.lane.b32.xlu0 %v2274_v2, %s2221_s15 }
  0xb6   :  { %943 = vrot.lane.b32.xlu2 %v2356_v18, %s2213_s7 }
  0xb7   :  { %v2439_v3 = vpop.permute.xlu1 %246  ;;  %v231_v24 = vpop.permute.xlu0 %230 }
  0xb8   :  { %v233_v26 = vrot.slane %v231_v24, 4  ;;  %v2442_v27 = vpop.permute.xlu2 %516  ;;  %v250_v17 = vrot.slane %v2439_v3, 4 }
  0xb9   :  { %v519_v28 = vrot.slane %v2442_v27, 4 }
  0xba   :  { %v234_v31 = vsel %vm53_vm0, %v232_v25, %v233_v26  ;;  %v237_v32 = vsel %vm235_vm12, %v231_v24, %v233_v26 }
  0xbb   :  { %v236_v2 = vsel %vm235_vm12, %v2389_v49, %v234_v31  ;;  %241 = vst [vmem:[#allocation2 + $0xf8] sm:$0xf] %v237_v32  ;;  %v523_v33 = vsel %vm521_vm13, %v2442_v27, %v519_v28 }
  0xbc   :  { %240 = vst [vmem:[#allocation2 + $0xf0] sm:$0xff] %v236_v2 }
  0xbd   :  { %960 = vrot.lane.b32.xlu1 %v2356_v18, %s2214_s8  ;;  %958 = vrot.lane.b32.xlu0 %v2349_v16, %s2214_s8  ;;  %527 = vst [vmem:[#allocation2 + $0x278] sm:$0xf] %v523_v33 }
  0xbe   :  { %703 = vrot.lane.b32.xlu2 %v2367_v30, %s2207_s29 }
  0xbf   :  { %v318_v34 = vpop.permute.xlu1 %317  ;;  %v302_v35 = vpop.permute.xlu0 %301 }
  0xc0   :  { %v321_v37 = vrot.slane %v318_v34, 4  ;;  %v304_v38 = vrot.slane %v302_v35, 4  ;;  %v2460_v39 = vpop.permute.xlu2 %480 }
  0xc1   :  { %v483_v40 = vrot.slane %v2460_v39, 4 }
  0xc2   :  { %v323_v41 = vsel %vm53_vm0, %v321_v37, %v322_v7  ;;  %v305_v42 = vsel %vm53_vm0, %v303_v36, %v304_v38  ;;  %v308_v43 = vsel %vm306_vm14, %v302_v35, %v304_v38 }
  0xc3   :  { %v325_v44 = vsel %vm324_vm10, %v318_v34, %v323_v41  ;;  %v307_v45 = vsel %vm306_vm14, %v2403_v59, %v305_v42  ;;  %312 = vst [vmem:[#allocation2 + $0x158] sm:$0xf] %v308_v43  ;;  %v487_v46 = vsel %vm485_vm15, %v2460_v39, %v483_v40 }
  0xc4   :  { %329 = vst [vmem:[#allocation2 + $0x168] sm:$0xff] %v325_v44 }
  0xc5   :  { %311 = vst [vmem:[#allocation2 + $0x150] sm:$0xff] %v307_v45  ;;  %720 = vrot.lane.b32.xlu1 %v2367_v30, %s2208_s30  ;;  %705 = vrot.lane.b32.xlu0 %v2365_v29, %s2207_s29 }
  0xc6   :  { %491 = vst [vmem:[#allocation2 + $0x248] sm:$0xf] %v487_v46  ;;  %722 = vrot.lane.b32.xlu2 %v2365_v29, %s2208_s30  ;;  %v1809_v46 = vld [vmem:[#allocation2 + $0xf0] sm:$0xf] }
  0xc7   :  { %v267_v47 = vpop.permute.xlu1 %266  ;;  %v265_v48 = vpop.permute.xlu0 %264 }
  0xc8   :  { %v269_v49 = vrot.slane %v267_v47, 4  ;;  %v268_v50 = vrot.slane %v265_v48, 4  ;;  %v2479_v51 = vpop.permute.xlu2 %443 }
  0xca   :  { %v273_v52 = vsel %vm271_vm4, %v267_v47, %v269_v49  ;;  %v270_v53 = vsel %vm53_vm0, %v268_v50, %v269_v49  ;;  %v2035_v47 = vld [vmem:[#allocation2 + $0xf4] sm:$0xf] }
  0xcb   :  { %277 = vst [vmem:[#allocation2 + $0x128] sm:$0xf] %v273_v52  ;;  %v272_v54 = vsel %vm271_vm4, %v265_v48, %v270_v53  ;;  %v2050_v55 = vld [vmem:[#allocation2 + $0x164] sm:$0xf0]  ;;  %v1859_v56 = vld [vmem:[#allocation2 + $0x168] sm:$0xf0] }
  0xcc   :  { %276 = vst [vmem:[#allocation2 + $0x120] sm:$0xff] %v272_v54  ;;  %v1857_v57 = vld [vmem:[#allocation2 + $0x150] sm:$0xf]  ;;  %v2047_v58 = vld [vmem:[#allocation2 + $0x154] sm:$0xf] }
  0xcd   :  { %909 = vrot.lane.b32.xlu1 %v2365_v29, %s2201_s23  ;;  %907 = vrot.lane.b32.xlu0 %v2367_v30, %s2201_s23  ;;  %v1858_v59 = vor.u32 %v2050_v55, %v1857_v57  ;;  %v1862_v60 = vor.u32 %v2047_v58, %v1859_v56  ;;  %v2032_v54 = vld [vmem:[#allocation2 + $0xd4] sm:$0xf0]  ;;  %v1787_v55 = vld [vmem:[#allocation2 + $0xd8] sm:$0xf0]  ;;  %v1785_v58 = vld [vmem:[#allocation2 + $0xc0] sm:$0xf] }
  0xce   :  { %924 = vrot.lane.b32.xlu2 %v2367_v30, %s2215_s9 }
  0xcf   :  { %1504 = vmatpush.bf16.msra.mxu0 %v1858_v59  ;;  %1530 = vmatpush.bf16.msra.mxu2 %v1862_v60  ;;  %v515_v61 = vpop.permute.xlu1 %514  ;;  %v285_v62 = vpop.permute.xlu0 %284  ;;  %v447_v59 = vrot.slane %v2479_v51, 4 }
  0xd0   :  { %v518_v0 = vrot.slane %v515_v61, 4  ;;  %v287_v1 = vrot.slane %v285_v62, 4  ;;  %v2491_v4 = vpop.permute.xlu2 %462 }
  0xd1   :  { %v465_v5 = vrot.slane %v2491_v4, 4 }
  0xd2   :  { %v520_v6 = vsel %vm53_vm0, %v518_v0, %v519_v28  ;;  %v288_v7 = vsel %vm53_vm0, %v286_v63, %v287_v1  ;;  %v290_v8 = vsel %vm127_vm7, %v285_v62, %v287_v1  ;;  %v2029_v62 = vld [vmem:[#allocation2 + $0xc4] sm:$0xf]  ;;  %v1786_v0 = vor.u32 %v2032_v54, %v1785_v58  ;;  %v1689_v54 = vld [vmem:[#allocation2] sm:$0xf] }
  0xd3   :  { %v522_v9 = vsel %vm521_vm13, %v515_v61, %v520_v6  ;;  %v289_v10 = vsel %vm127_vm7, %v2428_v20, %v288_v7  ;;  %294 = vst [vmem:[#allocation2 + $0x140] sm:$0xf] %v290_v8  ;;  %v469_v11 = vsel %vm467_vm5, %v2491_v4, %v465_v5  ;;  %v1833_v2 = vld [vmem:[#allocation2 + $0x120] sm:$0xf]  ;;  %v2041_v33 = vld [vmem:[#allocation2 + $0x124] sm:$0xf]  ;;  %v1790_v1 = vor.u32 %v2029_v62, %v1787_v55 }
  0xd4   :  { %v1313_v12 = vunpack.c.l.b16 %v522_v9  ;;  %v1314_v13 = vunpack.c.h.b16 %v522_v9  ;;  %293 = vst [vmem:[#allocation2 + $0x138] sm:$0xff] %v289_v10  ;;  %v2026_v6 = vld [vmem:[#allocation2 + $0xa4] sm:$0xf0]  ;;  %v1761_v4 = vld [vmem:[#allocation2 + $0x90] sm:$0xf] }
  0xd5   :  { %669 = vrot.lane.b32.xlu1 %v2349_v16, %s2205_s27  ;;  %926 = vrot.lane.b32.xlu0 %v2365_v29, %s2215_s9  ;;  %473 = vst [vmem:[#allocation2 + $0x230] sm:$0xf] %v469_v11  ;;  %v1763_v11 = vld [vmem:[#allocation2 + $0xa8] sm:$0xf0]  ;;  %v2008_v55 = vld [vmem:[#allocation2 + $0x14] sm:$0xf0] }
  0xd6   :  { %v1397_v14 = vpack.c.b16 %v1313_v12, %v1313_v12  ;;  %v1398_v15 = vpack.c.b16 %v1314_v13, %v1314_v13  ;;  %671 = vrot.lane.b32.xlu2 %v2356_v18, %s2205_s27  ;;  %v2005_v58 = vld [vmem:[#allocation2 + $0x4] sm:$0xf] }
  0xd7   :  { %v479_v19 = vpop.permute.xlu1 %478  ;;  %v249_v20 = vpop.permute.xlu0 %248 }
  0xd8   :  { %v482_v21 = vrot.slane %v479_v19, 4  ;;  %v251_v22 = vrot.slane %v249_v20, 4  ;;  %v1487_v23 = vsel %vm53_vm0, %v1397_v14, 0  ;;  %v1490_v24 = vsel %vm53_vm0, %v1398_v15, 0  ;;  %v2515_v25 = vpop.permute.xlu2 %425 }
  0xd9   :  { %1519 = vmatpush.bf16.msra.mxu1 %v1487_v23  ;;  %1545 = vmatpush.bf16.msra.mxu3 %v1490_v24  ;;  %v1737_v23 = vld [vmem:[#allocation2 + $0x60] sm:$0xf]  ;;  %v2017_v24 = vld [vmem:[#allocation2 + $0x64] sm:$0xf] }
  0xda   :  { %v484_v26 = vsel %vm53_vm0, %v482_v21, %v483_v40  ;;  %v252_v27 = vsel %vm53_vm0, %v250_v17, %v251_v22  ;;  %v255_v28 = vsel %vm253_vm3, %v249_v20, %v251_v22  ;;  %v1762_v21 = vor.u32 %v2026_v6, %v1761_v4 }
  0xdb   :  { %v486_v31 = vsel %vm485_vm15, %v479_v19, %v484_v26  ;;  %v254_v32 = vsel %vm253_vm3, %v2439_v3, %v252_v27  ;;  %259 = vst [vmem:[#allocation2 + $0x110] sm:$0xf] %v255_v28  ;;  %v2044_v34 = vld [vmem:[#allocation2 + $0x134] sm:$0xf0]  ;;  %v1835_v35 = vld [vmem:[#allocation2 + $0x138] sm:$0xf0] }
  0xdc   :  { %490 = vst [vmem:[#allocation2 + $0x240] sm:$0xff] %v486_v31  ;;  %v1834_v36 = vor.u32 %v2044_v34, %v1833_v2  ;;  %v1838_v37 = vor.u32 %v2041_v33, %v1835_v35  ;;  %v2023_v19 = vld [vmem:[#allocation2 + $0x94] sm:$0xf]  ;;  %v1739_v26 = vld [vmem:[#allocation2 + $0x78] sm:$0xf0] }
  0xdd   :  { %258 = vst [vmem:[#allocation2 + $0x108] sm:$0xff] %v254_v32  ;;  %688 = vrot.lane.b32.xlu1 %v2365_v29, %s2206_s28  ;;  %686 = vrot.lane.b32.xlu0 %v2367_v30, %s2206_s28  ;;  %v1766_v22 = vor.u32 %v2023_v19, %v1763_v11  ;;  %v1742_v34 = vor.u32 %v2017_v24, %v1739_v26 }
  0xde   :  { %873 = vrot.lane.b32.xlu2 %v2367_v30, %s2216_s10  ;;  %1505 = vmatpush.bf16.msra.mxu0 %v1834_v36 }
  0xdf   :  { %1531 = vmatpush.bf16.msra.mxu2 %v1838_v37  ;;  %v499_v3 = vpop.permute.xlu1 %498  ;;  %v497_v38 = vpop.permute.xlu0 %496 }
  0xe0   :  { %v501_v39 = vrot.slane %v499_v3, 4  ;;  %v500_v40 = vrot.slane %v497_v38, 4  ;;  %v2531_v41 = vpop.permute.xlu2 %977 }
  0xe1   :  { %v980_v42 = vrot.slane %v2531_v41, 4 }
  0xe2   :  { %v505_v43 = vsel %vm503_vm1, %v499_v3, %v501_v39  ;;  %v502_v44 = vsel %vm53_vm0, %v500_v40, %v501_v39  ;;  %v1713_v3 = vld [vmem:[#allocation2 + $0x30] sm:$0xf]  ;;  %v1715_v39 = vld [vmem:[#allocation2 + $0x48] sm:$0xf0] }
  0xe3   :  { %509 = vst [vmem:[#allocation2 + $0x260] sm:$0xf] %v505_v43  ;;  %v504_v45 = vsel %vm503_vm1, %v497_v38, %v502_v44  ;;  %v983_v48 = vsel %vm521_vm13, %v2531_v41, %v980_v42  ;;  %v1977_v10 = vld [vmem:[#allocation2 + $0x240] sm:$0xf]  ;;  %v2077_v12 = vld [vmem:[#allocation2 + $0x244] sm:$0xf] }
  0xe4   :  { %508 = vst [vmem:[#allocation2 + $0x258] sm:$0xff] %v504_v45  ;;  %v2038_v49 = vld [vmem:[#allocation2 + $0x104] sm:$0xf0]  ;;  %v1811_v50 = vld [vmem:[#allocation2 + $0x108] sm:$0xf0] }
  0xe5   :  { %890 = vrot.lane.b32.xlu1 %v2367_v30, %s2217_s11  ;;  %875 = vrot.lane.b32.xlu0 %v2365_v29, %s2216_s10  ;;  %v1810_v52 = vor.u32 %v2038_v49, %v1809_v46  ;;  %v1814_v53 = vor.u32 %v2035_v47, %v1811_v50  ;;  %987 = vst [vmem:[#allocation2 + $0x284] sm:$0xf] %v983_v48  ;;  %v2014_v38 = vld [vmem:[#allocation2 + $0x44] sm:$0xf0]  ;;  %v2011_v50 = vld [vmem:[#allocation2 + $0x34] sm:$0xf] }
  0xe6   :  { %892 = vrot.lane.b32.xlu2 %v2365_v29, %s2217_s11  ;;  %v1714_v48 = vor.u32 %v2014_v38, %v1713_v3 }
  0xe7   :  { %1506 = vmatpush.bf16.msra.mxu0 %v1810_v52  ;;  %1532 = vmatpush.bf16.msra.mxu2 %v1814_v53  ;;  %v461_v56 = vpop.permute.xlu1 %460  ;;  %v446_v57 = vpop.permute.xlu0 %445  ;;  %v1718_v53 = vor.u32 %v2011_v50, %v1715_v39 }
  0xe8   :  { %v464_v60 = vrot.slane %v461_v56, 4  ;;  %v448_v61 = vrot.slane %v446_v57, 4  ;;  %v2548_v63 = vpop.permute.xlu2 %788 }
  0xea   :  { %v466_v7 = vsel %vm53_vm0, %v464_v60, %v465_v5  ;;  %v449_v8 = vsel %vm53_vm0, %v447_v59, %v448_v61  ;;  %v451_v9 = vsel %vm127_vm7, %v446_v57, %v448_v61  ;;  %v1691_v59 = vld [vmem:[#allocation2 + $0x18] sm:$0xf0]  ;;  %v429_v60 = vrot.slane %v2515_v25, 4 }
  0xeb   :  { %v468_v13 = vsel %vm467_vm5, %v461_v56, %v466_v7  ;;  %v450_v14 = vsel %vm127_vm7, %v2479_v51, %v449_v8  ;;  %455 = vst [vmem:[#allocation2 + $0x218] sm:$0xf] %v451_v9  ;;  %1507 = vmatpush.bf16.msra.mxu0 %v1786_v0  ;;  %1533 = vmatpush.bf16.msra.mxu2 %v1790_v1  ;;  %v2080_v15 = vld [vmem:[#allocation2 + $0x254] sm:$0xf0]  ;;  %v1979_v17 = vld [vmem:[#allocation2 + $0x258] sm:$0xf0] }
  0xec   :  { %472 = vst [vmem:[#allocation2 + $0x228] sm:$0xff] %v468_v13  ;;  %v1978_v5 = vor.u32 %v2080_v15, %v1977_v10  ;;  %v1982_v20 = vor.u32 %v2077_v12, %v1979_v17  ;;  %v2020_v51 = vld [vmem:[#allocation2 + $0x74] sm:$0xf0]  ;;  %v1690_v1 = vor.u32 %v2008_v55, %v1689_v54  ;;  %v1694_v9 = vor.u32 %v2005_v58, %v1691_v59  ;;  %v564_v55 = vld [vmem:[#allocation3 + $0x1c] sm:$0xff] }
  0xed   :  { %454 = vst [vmem:[#allocation2 + $0x210] sm:$0xff] %v450_v14  ;;  %637 = vrot.lane.b32.xlu1 %v2356_v18, %s2203_s25  ;;  %635 = vrot.lane.b32.xlu0 %v2349_v16, %s2203_s25  ;;  %v1738_v33 = vor.u32 %v2020_v51, %v1737_v23 }
  0xee   :  { %1520 = vmatpush.bf16.msra.mxu1 %v1978_v5  ;;  %1546 = vmatpush.bf16.msra.mxu3 %v1982_v20 }
  0xef   :  { %1508 = vmatpush.bf16.msra.mxu0 %v1762_v21  ;;  %1534 = vmatpush.bf16.msra.mxu2 %v1766_v22  ;;  %v410_v27 = vpop.permute.xlu1 %409  ;;  %v408_v28 = vpop.permute.xlu0 %407 }
  0xf0   :  { %v412_v31 = vrot.slane %v410_v27, 4  ;;  %v411_v32 = vrot.slane %v408_v28, 4  ;;  %652 = vrot.lane.b32.xlu2 %v2349_v16, %s2204_s26  ;;  %v2564_v2 = vpop.permute.xlu2 %373 }
  0xf1   :  { %v376_v35 = vrot.slane %v2564_v2, 4 }
  0xf2   :  { %v416_v36 = vsel %vm414_vm9, %v410_v27, %v412_v31  ;;  %v413_v37 = vsel %vm53_vm0, %v411_v32, %v412_v31  ;;  %v792_v32 = vrot.slane %v2548_v63, 4 }
  0xf3   :  { %420 = vst [vmem:[#allocation2 + $0x1e8] sm:$0xf] %v416_v36  ;;  %v415_v40 = vsel %vm414_vm9, %v408_v28, %v413_v37  ;;  %1509 = vmatpush.bf16.msra.mxu0 %v1738_v33  ;;  %1535 = vmatpush.bf16.msra.mxu2 %v1742_v34  ;;  %v2074_v43 = vld [vmem:[#allocation2 + $0x224] sm:$0xf0]  ;;  %v1955_v44 = vld [vmem:[#allocation2 + $0x228] sm:$0xf0]  ;;  %v380_v45 = vsel %vm378_vm2, %v2564_v2, %v376_v35 }
  0xf4   :  { %419 = vst [vmem:[#allocation2 + $0x1e0] sm:$0xff] %v415_v40  ;;  %v1953_v46 = vld [vmem:[#allocation2 + $0x210] sm:$0xf]  ;;  %v2071_v47 = vld [vmem:[#allocation2 + $0x214] sm:$0xf]  ;;  %v818_v2 = vld [vmem:[#allocation3 + $0x18] sm:$0xff] }
  0xf5   :  { %839 = vrot.lane.b32.xlu1 %v2367_v30, %s2218_s12  ;;  %654 = vrot.lane.b32.xlu0 %v2356_v18, %s2204_s26  ;;  %v1954_v49 = vor.u32 %v2074_v43, %v1953_v46  ;;  %v1958_v52 = vor.u32 %v2071_v47, %v1955_v44  ;;  %384 = vst [vmem:[#allocation2 + $0x1b8] sm:$0xf] %v380_v45 }
  0xf7   :  { %1510 = vmatpush.bf16.msra.mxu0 %v1714_v48  ;;  %1521 = vmatpush.bf16.msra.mxu1 %v1954_v49  ;;  %v976_v56 = vpop.permute.xlu1 %975  ;;  %v428_v57 = vpop.permute.xlu0 %427 }
  0xf8   :  { %1536 = vmatpush.bf16.msra.mxu2 %v1718_v53  ;;  %1547 = vmatpush.bf16.msra.mxu3 %v1958_v52  ;;  %v979_v61 = vrot.slane %v976_v56, 4  ;;  %v430_v62 = vrot.slane %v428_v57, 4  ;;  %v2579_v0 = vpop.permute.xlu2 %737 }
  0xf9   :  { %841 = vrot.lane.b32.xlu2 %v2365_v29, %s2218_s12  ;;  %v741_v58 = vrot.slane %v2579_v0, 4 }
  0xfa   :  { %v981_v6 = vsel %vm53_vm0, %v979_v61, %v980_v42  ;;  %v431_v7 = vsel %vm53_vm0, %v429_v60, %v430_v62  ;;  %v434_v8 = vsel %vm432_vm8, %v428_v57, %v430_v62 }
  0xfb   :  { %v982_v10 = vsel %vm521_vm13, %v976_v56, %v981_v6  ;;  %v433_v11 = vsel %vm432_vm8, %v2515_v25, %v431_v7  ;;  %438 = vst [vmem:[#allocation2 + $0x200] sm:$0xf] %v434_v8  ;;  %1511 = vmatpush.bf16.msra.mxu0 %v1690_v1  ;;  %v1929_v4 = vld [vmem:[#allocation2 + $0x1e0] sm:$0xf]  ;;  %v2065_v19 = vld [vmem:[#allocation2 + $0x1e4] sm:$0xf] }
  0xfc   :  { %986 = vst [vmem:[#allocation2 + $0x27c] sm:$0xff] %v982_v10  ;;  %1537 = vmatpush.bf16.msra.mxu2 %v1694_v9  ;;  %vm396_vm13 = vcmask 850944  }
  0xfd   :  { %437 = vst [vmem:[#allocation2 + $0x1f8] sm:$0xff] %v433_v11  ;;  %858 = vrot.lane.b32.xlu1 %v2365_v29, %s2219_s13  ;;  %856 = vrot.lane.b32.xlu0 %v2367_v30, %s2219_s13 }
  0xff   :  { %v774_v41 = vpop.permute.xlu1 %773  ;;  %v772_v42 = vpop.permute.xlu0 %771 }
 0x100   :  { %v776_v12 = vrot.slane %v774_v41, 4  ;;  %v775_v13 = vrot.slane %v772_v42, 4  ;;  %v2595_v14 = vpop.permute.xlu2 %756 }
 0x101   :  { %601 = vrot.lane.b32.xlu2 %v2367_v30, %s2201_s23  ;;  %v759_v25 = vrot.slane %v2595_v14, 4 }
 0x102   :  { %v779_v15 = vsel %vm306_vm14, %v774_v41, %v776_v12  ;;  %v777_v17 = vsel %vm53_vm0, %v775_v13, %v776_v12  ;;  %v529_v12 = vld [vmem:[#allocation3 + $0x14] sm:$0xff] }
 0x103   :  { %783 = vst [vmem:[#allocation2 + $0x164] sm:$0xf] %v779_v15  ;;  %v778_v5 = vsel %vm306_vm14, %v772_v42, %v777_v17  ;;  %v2603_v20 = vld [vmem:[#allocation2 + $0x278] sm:$0xff]  ;;  %v762_v21 = vsel %vm127_vm7, %v2595_v14, %v759_v25 }
 0x104   :  { %782 = vst [vmem:[#allocation2 + $0x15c] sm:$0xff] %v778_v5  ;;  %v2068_v22 = vld [vmem:[#allocation2 + $0x1f4] sm:$0xf0]  ;;  %v1931_v51 = vld [vmem:[#allocation2 + $0x1f8] sm:$0xf0]  ;;  %v1316_v23 = vunpack.c.h.b16 %v2603_v20 }
 0x105   :  { %618 = vrot.lane.b32.xlu1 %v2367_v30, %s2202_s24  ;;  %603 = vrot.lane.b32.xlu0 %v2365_v29, %s2201_s23  ;;  %v1930_v24 = vor.u32 %v2068_v22, %v1929_v4  ;;  %v1934_v26 = vor.u32 %v2065_v19, %v1931_v51  ;;  %766 = vst [vmem:[#allocation2 + $0x14c] sm:$0xf] %v762_v21 }
 0x106   :  { %v1400_v27 = vpack.c.b16 %v1316_v23, %v1316_v23 }
 0x107   :  { %1522 = vmatpush.bf16.msra.mxu1 %v1930_v24  ;;  %1548 = vmatpush.bf16.msra.mxu3 %v1934_v26  ;;  %v372_v28 = vpop.permute.xlu1 %371  ;;  %v791_v31 = vpop.permute.xlu0 %790 }
 0x108   :  { %v375_v33 = vrot.slane %v372_v28, 4  ;;  %v793_v34 = vrot.slane %v791_v31, 4  ;;  %v1496_v36 = vsel %vm53_vm0, %v1400_v27, 0  ;;  %v2616_v37 = vpop.permute.xlu2 %353 }
 0x109   :  { %1597 = vmatpush.bf16.msrb.mxu2 %v1496_v36  ;;  %620 = vrot.lane.b32.xlu2 %v2365_v29, %s2202_s24  ;;  %v357_v27 = vrot.slane %v2616_v37, 4 }
 0x10a   :  { %v377_v3 = vsel %vm53_vm0, %v375_v33, %v376_v35  ;;  %v794_v38 = vsel %vm53_vm0, %v792_v32, %v793_v34  ;;  %v796_v39 = vsel %vm324_vm10, %v791_v31, %v793_v34 }
 0x10b   :  { %v379_v40 = vsel %vm378_vm2, %v372_v28, %v377_v3  ;;  %v795_v43 = vsel %vm324_vm10, %v2548_v63, %v794_v38  ;;  %800 = vst [vmem:[#allocation2 + $0x17c] sm:$0xf] %v796_v39  ;;  %v2048_v52 = vld [vmem:[#allocation2 + $0x15c] sm:$0xf]  ;;  %vm342_vm10 = vcmask 719872   ;;  %v1315_v39 = vunpack.c.l.b16 %v2603_v20 }
 0x10c   :  { %383 = vst [vmem:[#allocation2 + $0x1b0] sm:$0xff] %v379_v40  ;;  %v2691_v40 = vld [vmem:[#allocation6] sm:$0xff] }
 0x10d   :  { %799 = vst [vmem:[#allocation2 + $0x174] sm:$0xff] %v795_v43  ;;  %807 = vrot.lane.b32.xlu1 %v2356_v18, %s2220_s14  ;;  %805 = vrot.lane.b32.xlu0 %v2349_v16, %s2220_s14 }
 0x10f   :  { %v392_v35 = vpop.permute.xlu1 %391  ;;  %v390_v44 = vpop.permute.xlu0 %389 }
 0x110   :  { %v394_v45 = vrot.slane %v392_v35, 4  ;;  %v393_v46 = vrot.slane %v390_v44, 4  ;;  %v2632_v47 = vpop.permute.xlu2 %943 }
 0x111   :  { %822 = vrot.lane.b32.xlu2 %v818_v2, %s2221_s15  ;;  %v946_v63 = vrot.slane %v2632_v47, 4 }
 0x112   :  { %v398_v48 = vsel %vm396_vm13, %v392_v35, %v394_v45  ;;  %v395_v49 = vsel %vm53_vm0, %v393_v46, %v394_v45 }
 0x113   :  { %402 = vst [vmem:[#allocation2 + $0x1d0] sm:$0xf] %v398_v48  ;;  %v397_v50 = vsel %vm396_vm13, %v390_v44, %v395_v49  ;;  %v949_v16 = vsel %vm485_vm15, %v2632_v47, %v946_v63  ;;  %v1905_v6 = vld [vmem:[#allocation2 + $0x1b0] sm:$0xf]  ;;  %v2059_v7 = vld [vmem:[#allocation2 + $0x1b4] sm:$0xf]  ;;  %v1072_v47 = vunpack.c.h.b16 %v2691_v40  ;;  %v1399_v49 = vpack.c.b16 %v1315_v39, %v1315_v39 }
 0x114   :  { %401 = vst [vmem:[#allocation2 + $0x1c8] sm:$0xff] %v397_v50  ;;  %v1867_v53 = vld [vmem:[#allocation2 + $0x170] sm:$0xf0]  ;;  %v2027_v39 = vld [vmem:[#allocation2 + $0xac] sm:$0xf0] }
 0x115   :  { %567 = vrot.lane.b32.xlu1 %v2367_v30, %s2199_s1  ;;  %824 = vrot.lane.b32.xlu0 %v2356_v18, %s2221_s15  ;;  %v1870_v54 = vor.u32 %v2048_v52, %v1867_v53  ;;  %953 = vst [vmem:[#allocation2 + $0x254] sm:$0xf] %v949_v16 }
 0x117   :  { %1582 = vmatpush.bf16.msrb.mxu0 %v1870_v54  ;;  %v755_v56 = vpop.permute.xlu1 %754  ;;  %v740_v57 = vpop.permute.xlu0 %739 }
 0x118   :  { %v758_v59 = vrot.slane %v755_v56, 4  ;;  %v742_v60 = vrot.slane %v740_v57, 4  ;;  %v2648_v61 = vpop.permute.xlu2 %703 }
 0x119   :  { %569 = vrot.lane.b32.xlu2 %v564_v55, %s2199_s1 }
 0x11a   :  { %v760_v62 = vsel %vm53_vm0, %v758_v59, %v759_v25  ;;  %v743_v18 = vsel %vm53_vm0, %v741_v58, %v742_v60  ;;  %v745_v1 = vsel %vm271_vm4, %v740_v57, %v742_v60  ;;  %v2045_v57 = vld [vmem:[#allocation2 + $0x13c] sm:$0xf0]  ;;  %v2704_v59 = vpack.c.b16 %v1072_v47, %v1072_v47 }
 0x11b   :  { %v761_v8 = vsel %vm127_vm7, %v755_v56, %v760_v62  ;;  %v744_v9 = vsel %vm271_vm4, %v2579_v0, %v743_v18  ;;  %749 = vst [vmem:[#allocation2 + $0x134] sm:$0xf] %v745_v1  ;;  %v2062_v10 = vld [vmem:[#allocation2 + $0x1c4] sm:$0xf0]  ;;  %v1907_v11 = vld [vmem:[#allocation2 + $0x1c8] sm:$0xf0] }
 0x11c   :  { %765 = vst [vmem:[#allocation2 + $0x144] sm:$0xff] %v761_v8  ;;  %v1906_v41 = vor.u32 %v2062_v10, %v1905_v6  ;;  %v1910_v42 = vor.u32 %v2059_v7, %v1907_v11  ;;  %vm360_vm4 = vcmask 703488   ;;  %v2081_v58 = vld [vmem:[#allocation2 + $0x25c] sm:$0xf0]  ;;  %v1493_v62 = vsel %vm53_vm0, %v1399_v49, 0 }
 0x11d   :  { %748 = vst [vmem:[#allocation2 + $0x12c] sm:$0xff] %v744_v9  ;;  %586 = vrot.lane.b32.xlu1 %v2365_v29, %s2200_s22  ;;  %584 = vrot.lane.b32.xlu0 %v2367_v30, %s2200_s22  ;;  %v1985_v1 = vld [vmem:[#allocation2 + $0x248] sm:$0xf]  ;;  %v707_v6 = vrot.slane %v2648_v61, 4 }
 0x11e   :  { %1523 = vmatpush.bf16.msra.mxu1 %v1906_v41  ;;  %1549 = vmatpush.bf16.msra.mxu3 %v1910_v42  ;;  %v1841_v9 = vld [vmem:[#allocation2 + $0x128] sm:$0xf]  ;;  %v1986_v41 = vor.u32 %v2081_v58, %v1985_v1  ;;  %v2052_v58 = vld [vmem:[#allocation2 + $0x174] sm:$0xf0] }
 0x11f   :  { %v338_v13 = vpop.permute.xlu1 %337  ;;  %v336_v14 = vpop.permute.xlu0 %335  ;;  %v1842_v11 = vor.u32 %v2045_v57, %v1841_v9  ;;  %v1873_v9 = vld [vmem:[#allocation2 + $0x160] sm:$0xf] }
 0x120   :  { %v340_v0 = vrot.slane %v338_v13, 4  ;;  %v339_v25 = vrot.slane %v336_v14, 4  ;;  %v2663_v15 = vpop.permute.xlu2 %722 }
 0x121   :  { %533 = vrot.lane.b32.xlu2 %v529_v12, %s2198_s21  ;;  %v725_v17 = vrot.slane %v2663_v15, 4 }
 0x122   :  { %v344_v4 = vsel %vm342_vm10, %v338_v13, %v340_v0  ;;  %v341_v5 = vsel %vm53_vm0, %v339_v25, %v340_v0  ;;  %v1961_v0 = vld [vmem:[#allocation2 + $0x218] sm:$0xf] }
 0x123   :  { %348 = vst [vmem:[#allocation2 + $0x188] sm:$0xf] %v344_v4  ;;  %v343_v19 = vsel %vm342_vm10, %v336_v14, %v341_v5  ;;  %v1843_v21 = vld [vmem:[#allocation2 + $0x140] sm:$0xf0]  ;;  %v728_v22 = vsel %vm253_vm3, %v2663_v15, %v725_v17  ;;  %v2039_v14 = vld [vmem:[#allocation2 + $0x10c] sm:$0xf0] }
 0x124   :  { %347 = vst [vmem:[#allocation2 + $0x180] sm:$0xff] %v343_v19  ;;  %v2042_v51 = vld [vmem:[#allocation2 + $0x12c] sm:$0xf]  ;;  %v1817_v19 = vld [vmem:[#allocation2 + $0xf8] sm:$0xf] }
 0x125   :  { %550 = vrot.lane.b32.xlu1 %v2367_v30, %s2197_s0  ;;  %535 = vrot.lane.b32.xlu0 %v2365_v29, %s2198_s21  ;;  %v1846_v23 = vor.u32 %v2042_v51, %v1843_v21  ;;  %732 = vst [vmem:[#allocation2 + $0x11c] sm:$0xf] %v728_v22  ;;  %v2075_v21 = vld [vmem:[#allocation2 + $0x22c] sm:$0xf0]  ;;  %v1818_v22 = vor.u32 %v2039_v14, %v1817_v19  ;;  %v2046_v14 = vld [vmem:[#allocation2 + $0x144] sm:$0xf0] }
 0x126   :  { %v1962_v51 = vor.u32 %v2075_v21, %v1961_v0  ;;  %v1721_v0 = vld [vmem:[#allocation2 + $0x38] sm:$0xf]  ;;  %v2009_v19 = vld [vmem:[#allocation2 + $0x1c] sm:$0xf0]  ;;  %s2224_s21 = smov 24  }
 0x127   :  { %1583 = vmatpush.bf16.msrb.mxu0 %v1846_v23  ;;  %v942_v24 = vpop.permute.xlu1 %941  ;;  %v356_v26 = vpop.permute.xlu0 %355 }
 0x128   :  { %v945_v28 = vrot.slane %v942_v24, 4  ;;  %v358_v31 = vrot.slane %v356_v26, 4  ;;  %v2679_v32 = vpop.permute.xlu2 %924 }
 0x129   :  { %552 = vrot.lane.b32.xlu2 %v564_v55, %s2197_s0  ;;  %v2051_v55 = vld [vmem:[#allocation2 + $0x16c] sm:$0xf0]  ;;  %s2223_s0 = smov 384  }
 0x12a   :  { %v947_v30 = vsel %vm53_vm0, %v945_v28, %v946_v63  ;;  %v359_v29 = vsel %vm53_vm0, %v357_v27, %v358_v31  ;;  %v362_v33 = vsel %vm360_vm4, %v356_v26, %v358_v31  ;;  %v2033_v26 = vld [vmem:[#allocation2 + $0xdc] sm:$0xf0] }
 0x12b   :  { %v948_v34 = vsel %vm485_vm15, %v942_v24, %v947_v30  ;;  %v361_v36 = vsel %vm360_vm4, %v2616_v37, %v359_v29  ;;  %366 = vst [vmem:[#allocation2 + $0x1a0] sm:$0xf] %v362_v33  ;;  %v1865_v37 = vld [vmem:[#allocation2 + $0x158] sm:$0xf]  ;;  %v1881_v48 = vld [vmem:[#allocation2 + $0x180] sm:$0xf] }
 0x12c   :  { %952 = vst [vmem:[#allocation2 + $0x24c] sm:$0xff] %v948_v34  ;;  %v2053_v20 = vld [vmem:[#allocation2 + $0x184] sm:$0xf]  ;;  %v1866_v56 = vor.u32 %v2051_v55, %v1865_v37  ;;  %v2069_v27 = vld [vmem:[#allocation2 + $0x1fc] sm:$0xf0]  ;;  %v928_v55 = vrot.slane %v2679_v32, 4 }
 0x12d   :  { %365 = vst [vmem:[#allocation2 + $0x198] sm:$0xff] %v361_v36  ;;  %v1793_v30 = vld [vmem:[#allocation2 + $0xc8] sm:$0xf]  ;;  %vm2864_vm15 = vcmask 269312  }
 0x12e   :  { %v1937_v29 = vld [vmem:[#allocation2 + $0x1e8] sm:$0xf] }
 0x12f   :  { %v961_v3 = vpop.permute.xlu1 %960  ;;  %v959_v38 = vpop.permute.xlu0 %958 }
 0x130   :  { %v963_v43 = vrot.slane %v961_v3, 4  ;;  %v962_v2 = vrot.slane %v959_v38, 4  ;;  %v2693_v35 = vpop.permute.xlu2 %671 }
 0x131   :  { %v674_v44 = vrot.slane %v2693_v35, 4 }
 0x132   :  { %v966_v45 = vsel %vm503_vm1, %v961_v3, %v963_v43  ;;  %v964_v46 = vsel %vm53_vm0, %v962_v2, %v963_v43  ;;  %v1794_v3 = vor.u32 %v2033_v26, %v1793_v30 }
 0x133   :  { %970 = vst [vmem:[#allocation2 + $0x26c] sm:$0xf] %v966_v45  ;;  %v965_v63 = vsel %vm503_vm1, %v959_v38, %v964_v46  ;;  %v677_v50 = vsel %vm199_vm6, %v2693_v35, %v674_v44  ;;  %v2078_v15 = vld [vmem:[#allocation2 + $0x24c] sm:$0xf]  ;;  %v1938_v38 = vor.u32 %v2069_v27, %v1937_v29  ;;  %v2063_v45 = vld [vmem:[#allocation2 + $0x1cc] sm:$0xf0] }
 0x134   :  { %969 = vst [vmem:[#allocation2 + $0x264] sm:$0xff] %v965_v63  ;;  %v2056_v16 = vld [vmem:[#allocation2 + $0x194] sm:$0xf0]  ;;  %v1883_v52 = vld [vmem:[#allocation2 + $0x198] sm:$0xf0]  ;;  %vm2853_vm1 = vcmask 924672  }
 0x135   :  { %v1882_v53 = vor.u32 %v2056_v16, %v1881_v48  ;;  %v1886_v54 = vor.u32 %v2053_v20, %v1883_v52  ;;  %681 = vst [vmem:[#allocation2 + $0xd4] sm:$0xf] %v677_v50  ;;  %v1769_v63 = vld [vmem:[#allocation2 + $0x98] sm:$0xf]  ;;  %v1745_v50 = vld [vmem:[#allocation2 + $0x68] sm:$0xf] }
 0x136   :  { %v1913_v48 = vld [vmem:[#allocation2 + $0x1b8] sm:$0xf]  ;;  %v1770_v20 = vor.u32 %v2027_v39, %v1769_v63 }
 0x137   :  { %1524 = vmatpush.bf16.msra.mxu1 %v1882_v53  ;;  %1550 = vmatpush.bf16.msra.mxu3 %v1886_v54  ;;  %v721_v60 = vpop.permute.xlu1 %720  ;;  %v706_v18 = vpop.permute.xlu0 %705  ;;  %v1914_v49 = vor.u32 %v2063_v45, %v1913_v48  ;;  %v2021_v53 = vld [vmem:[#allocation2 + $0x7c] sm:$0xf0] }
 0x138   :  { %v724_v7 = vrot.slane %v721_v60, 4  ;;  %v708_v8 = vrot.slane %v706_v18, 4  ;;  %v2708_v10 = vpop.permute.xlu2 %873  ;;  %v2057_v54 = vld [vmem:[#allocation2 + $0x19c] sm:$0xf0] }
 0x13a   :  { %v726_v42 = vsel %vm53_vm0, %v724_v7, %v725_v17  ;;  %v709_v12 = vsel %vm53_vm0, %v707_v6, %v708_v8  ;;  %v711_v13 = vsel %vm235_vm12, %v706_v18, %v708_v8  ;;  %2000 = vmatmul.msk.bf16.vlgmr.msra.gmra.mxu3 %vm342_vm10, %v2704_v59  ;;  %1999 = vmatmul.msk.bf16.vlgmr.msra.gmra.mxu1 %vm342_vm10, %v2704_v59  ;;  %v1889_v18 = vld [vmem:[#allocation2 + $0x188] sm:$0xf] }
 0x13b   :  { %1556 = vmatpush.bf16.msrb.mxu1 %v1866_v56  ;;  %1571 = vmatpush.bf16.msrb.mxu3 %v1493_v62  ;;  %v727_v25 = vsel %vm253_vm3, %v721_v60, %v726_v42  ;;  %v710_v4 = vsel %vm235_vm12, %v2648_v61, %v709_v12  ;;  %715 = vst [vmem:[#allocation2 + $0x104] sm:$0xf] %v711_v13  ;;  %v1987_v17 = vld [vmem:[#allocation2 + $0x260] sm:$0xf0]  ;;  %v2015_v13 = vld [vmem:[#allocation2 + $0x4c] sm:$0xf0]  ;;  %vm2854_vm3 = vmmov %vm2853_vm1 }
 0x13c   :  { %731 = vst [vmem:[#allocation2 + $0x114] sm:$0xff] %v727_v25  ;;  %v1990_v5 = vor.u32 %v2078_v15, %v1987_v17  ;;  %v2733_v60 = vld [vmem:[#allocation2 + $0x280] sm:$0xff]  ;;  %v1746_v62 = vor.u32 %v2021_v53, %v1745_v50  ;;  %v1890_v8 = vor.u32 %v2057_v54, %v1889_v18  ;;  %v1874_v12 = vor.u32 %v2052_v58, %v1873_v9  ;;  %v2082_v29 = vld [vmem:[#allocation2 + $0x264] sm:$0xf0] }
 0x13d   :  { %714 = vst [vmem:[#allocation2 + $0xfc] sm:$0xff] %v710_v4  ;;  %v1317_v35 = vunpack.c.l.b16 %v2733_v60  ;;  %v1722_v25 = vor.u32 %v2015_v13, %v1721_v0  ;;  %vm2862_vm12 = vcmask 72704  }
 0x13e   :  { %1598 = vmatpush.bf16.msrb.mxu2 %v1990_v5  ;;  %v1697_v5 = vld [vmem:[#allocation2 + $0x8] sm:$0xf]  ;;  %vm2863_vm14 = vmmov %vm2862_vm12 }
 0x13f   :  { %1557 = vmatpush.bf16.msrb.mxu1 %v1842_v11  ;;  %1572 = vmatpush.bf16.msrb.mxu3 %v1986_v41  ;;  %v910_v23 = vpop.permute.xlu1 %909  ;;  %v908_v24 = vpop.permute.xlu0 %907  ;;  %v1698_v27 = vor.u32 %v2009_v19, %v1697_v5 }
 0x140   :  { %v912_v28 = vrot.slane %v910_v23, 4  ;;  %v911_v61 = vrot.slane %v908_v24, 4  ;;  %v2722_v31 = vpop.permute.xlu2 %892 }
 0x141   :  { %v895_v33 = vrot.slane %v2722_v31, 4 }
 0x142   :  { %v915_v34 = vsel %vm127_vm7, %v910_v23, %v912_v28  ;;  %v913_v36 = vsel %vm53_vm0, %v911_v61, %v912_v28 }
 0x143   :  { %1558 = vmatpush.bf16.msrb.mxu1 %v1818_v22  ;;  %1573 = vmatpush.bf16.msrb.mxu3 %v1962_v51  ;;  %919 = vst [vmem:[#allocation2 + $0x224] sm:$0xf] %v915_v34  ;;  %v914_v43 = vsel %vm127_vm7, %v908_v24, %v913_v36  ;;  %v1819_v2 = vld [vmem:[#allocation2 + $0x110] sm:$0xf0]  ;;  %v898_v46 = vsel %vm432_vm8, %v2722_v31, %v895_v33  ;;  %v2040_v23 = vld [vmem:[#allocation2 + $0x114] sm:$0xf0] }
 0x144   :  { %918 = vst [vmem:[#allocation2 + $0x21c] sm:$0xff] %v914_v43  ;;  %v2036_v37 = vld [vmem:[#allocation2 + $0xfc] sm:$0xf]  ;;  %v1825_v51 = vld [vmem:[#allocation2 + $0x100] sm:$0xf] }
 0x145   :  { %v1822_v47 = vor.u32 %v2036_v37, %v1819_v2  ;;  %902 = vst [vmem:[#allocation2 + $0x20c] sm:$0xf] %v898_v46  ;;  %v1826_v61 = vor.u32 %v2040_v23, %v1825_v51  ;;  %v1993_v43 = vld [vmem:[#allocation2 + $0x250] sm:$0xf] }
 0x146   :  { %v1994_v37 = vor.u32 %v2082_v29, %v1993_v43 }
 0x147   :  { %1559 = vmatpush.bf16.msrb.mxu1 %v1794_v3  ;;  %1574 = vmatpush.bf16.msrb.mxu3 %v1938_v38  ;;  %v670_v16 = vpop.permute.xlu1 %669  ;;  %v927_v52 = vpop.permute.xlu0 %926 }
 0x148   :  { %1584 = vmatpush.bf16.msrb.mxu0 %v1822_v47  ;;  %v673_v56 = vrot.slane %v670_v16, 4  ;;  %v929_v57 = vrot.slane %v927_v52, 4  ;;  %v877_v47 = vrot.slane %v2708_v10, 4 }
 0x14a   :  { %v675_v1 = vsel %vm53_vm0, %v673_v56, %v674_v44  ;;  %v930_v6 = vsel %vm53_vm0, %v928_v55, %v929_v57  ;;  %v932_v7 = vsel %vm467_vm5, %v927_v52, %v929_v57  ;;  %v2740_v11 = vpop.permute.xlu2 %652  ;;  %v1849_v44 = vld [vmem:[#allocation2 + $0x130] sm:$0xf] }
 0x14b   :  { %1560 = vmatpush.bf16.msrb.mxu1 %v1770_v20  ;;  %1575 = vmatpush.bf16.msrb.mxu3 %v1914_v49  ;;  %v676_v41 = vsel %vm199_vm6, %v670_v16, %v675_v1  ;;  %v931_v42 = vsel %vm467_vm5, %v2679_v32, %v930_v6  ;;  %936 = vst [vmem:[#allocation2 + $0x23c] sm:$0xf] %v932_v7  ;;  %v2072_v36 = vld [vmem:[#allocation2 + $0x21c] sm:$0xf]  ;;  %v1969_v52 = vld [vmem:[#allocation2 + $0x220] sm:$0xf] }
 0x14c   :  { %680 = vst [vmem:[#allocation2 + $0xcc] sm:$0xff] %v676_v41  ;;  %v1850_v17 = vor.u32 %v2046_v14, %v1849_v44  ;;  %v1401_v32 = vpack.c.b16 %v1317_v35, %v1317_v35  ;;  %vm2855_vm5 = vcmask 56320   ;;  %v656_v5 = vrot.slane %v2740_v11, 4 }
 0x14d   :  { %935 = vst [vmem:[#allocation2 + $0x234] sm:$0xff] %v931_v42  ;;  %vm2856_vm6 = vcmask 916480  }
 0x14e   :  { %v1499_v30 = vsel %vm53_vm0, %v1401_v32, 0 }
 0x14f   :  { %1561 = vmatpush.bf16.msrb.mxu1 %v1746_v62  ;;  %1576 = vmatpush.bf16.msrb.mxu3 %v1890_v8  ;;  %v689_v4 = vpop.permute.xlu1 %688  ;;  %v687_v15 = vpop.permute.xlu0 %686 }
 0x150   :  { %v691_v21 = vrot.slane %v689_v4, 4  ;;  %v690_v22 = vrot.slane %v687_v15, 4 }
 0x152   :  { %2001 = vmatmul.msk.bf16.vlgmr.msrb.gmra.mxu3 %vm342_vm10, %v2704_v59  ;;  %v694_v24 = vsel %vm217_vm11, %v689_v4, %v691_v21  ;;  %v692_v26 = vsel %vm53_vm0, %v690_v22, %v691_v21 }
 0x153   :  { %1608 = vmatpush.bf16.msra.mxu3 %v1874_v12  ;;  %1562 = vmatpush.bf16.msrb.mxu1 %v1722_v25  ;;  %698 = vst [vmem:[#allocation2 + $0xec] sm:$0xf] %v694_v24  ;;  %v693_v28 = vsel %vm217_vm11, %v687_v15, %v692_v26  ;;  %v2752_v34 = vpop.permute.xlu2 %841  ;;  %v2030_v53 = vld [vmem:[#allocation2 + $0xcc] sm:$0xf]  ;;  %v1801_v54 = vld [vmem:[#allocation2 + $0xd0] sm:$0xf] }
 0x154   :  { %697 = vst [vmem:[#allocation2 + $0xe4] sm:$0xff] %v693_v28  ;;  %v1963_v3 = vld [vmem:[#allocation2 + $0x230] sm:$0xf0]  ;;  %v844_v38 = vrot.slane %v2752_v34, 4  ;;  %v2076_v20 = vld [vmem:[#allocation2 + $0x234] sm:$0xf0] }
 0x155   :  { %v1966_v39 = vor.u32 %v2072_v36, %v1963_v3  ;;  %v1970_v57 = vor.u32 %v2076_v20, %v1969_v52 }
 0x156   :  { %v847_v2 = vsel %vm378_vm2, %v2752_v34, %v844_v38 }
 0x157   :  { %1609 = vmatpush.bf16.msra.mxu3 %v1850_v17  ;;  %1563 = vmatpush.bf16.msrb.mxu1 %v1698_v27  ;;  %v891_v45 = vpop.permute.xlu1 %890  ;;  %v876_v46 = vpop.permute.xlu0 %875  ;;  %851 = vst [vmem:[#allocation2 + $0x1c4] sm:$0xf] %v847_v2 }
 0x158   :  { %1599 = vmatpush.bf16.msrb.mxu2 %v1966_v39  ;;  %v894_v63 = vrot.slane %v891_v45, 4  ;;  %v878_v48 = vrot.slane %v876_v46, 4 }
 0x15a   :  { %v896_v49 = vsel %vm53_vm0, %v894_v63, %v895_v33  ;;  %v879_v50 = vsel %vm53_vm0, %v877_v47, %v878_v48  ;;  %v881_v16 = vsel %vm414_vm9, %v876_v46, %v878_v48 }
 0x15b   :  { %1610 = vmatpush.bf16.msra.mxu3 %v1826_v61  ;;  %1623 = vmatpush.bf16.msra.mxu1 %v1499_v30  ;;  %v897_v55 = vsel %vm432_vm8, %v891_v45, %v896_v49  ;;  %v880_v56 = vsel %vm414_vm9, %v2708_v10, %v879_v50  ;;  %885 = vst [vmem:[#allocation2 + $0x1f4] sm:$0xf] %v881_v16  ;;  %v1795_v58 = vld [vmem:[#allocation2 + $0xe0] sm:$0xf0]  ;;  %v2034_v62 = vld [vmem:[#allocation2 + $0xe4] sm:$0xf0]  ;;  %v2768_v18 = vpop.permute.xlu2 %601  ;;  %vm2857_vm8 = vmmov %vm2856_vm6  ;;  %v1071_v61 = vunpack.c.l.b16 %v2691_v40 }
 0x15c   :  { %901 = vst [vmem:[#allocation2 + $0x204] sm:$0xff] %v897_v55  ;;  %v1798_v31 = vor.u32 %v2030_v53, %v1795_v58  ;;  %v1802_v33 = vor.u32 %v2034_v62, %v1801_v54  ;;  %v605_v20 = vrot.slane %v2768_v18, 4  ;;  %vm2859_vm9 = vmmov %vm2855_vm5 }
 0x15d   :  { %884 = vst [vmem:[#allocation2 + $0x1ec] sm:$0xff] %v880_v56  ;;  %v2786_v34 = vpack.c.b16 %v1071_v61, %v1071_v61 }
 0x15e   :  { %1585 = vmatpush.bf16.msrb.mxu0 %v1798_v31 }
 0x15f   :  { %1624 = vmatpush.bf16.msra.mxu1 %v1994_v37  ;;  %1611 = vmatpush.bf16.msra.mxu3 %v1802_v33  ;;  %v638_v1 = vpop.permute.xlu1 %637  ;;  %v636_v6 = vpop.permute.xlu0 %635 }
 0x160   :  { %v640_v7 = vrot.slane %v638_v1, 4  ;;  %v639_v8 = vrot.slane %v636_v6, 4  ;;  %1538 = vmatmul.bf16.vlgmr.msra.gmra.mxu2 %v2786_v34  ;;  %1512 = vmatmul.bf16.vlgmr.msra.gmra.mxu0 %v2786_v34 }
 0x161   :  { %1564 = vmatmul.bf16.vlgmr.msrb.gmra.mxu1 %v2786_v34 }
 0x162   :  { %v643_v9 = vsel %vm2853_vm1, %v638_v1, %v640_v7  ;;  %v641_v10 = vsel %vm53_vm0, %v639_v8, %v640_v7 }
 0x163   :  { %1625 = vmatpush.bf16.msra.mxu1 %v1970_v57  ;;  %647 = vst [vmem:[#allocation2 + $0xa4] sm:$0xf] %v643_v9  ;;  %v642_v41 = vsel %vm2854_vm3, %v636_v6, %v641_v10  ;;  %v1939_v42 = vld [vmem:[#allocation2 + $0x200] sm:$0xf0]  ;;  %v2070_v12 = vld [vmem:[#allocation2 + $0x204] sm:$0xf0]  ;;  %v621_v13 = vpop.permute.xlu2 %620 }
 0x164   :  { %646 = vst [vmem:[#allocation2 + $0x9c] sm:$0xff] %v642_v41  ;;  %v2066_v35 = vld [vmem:[#allocation2 + $0x1ec] sm:$0xf]  ;;  %v1945_v44 = vld [vmem:[#allocation2 + $0x1f0] sm:$0xf]  ;;  %v623_v14 = vrot.slane %v621_v13, 4 }
 0x165   :  { %v1942_v0 = vor.u32 %v2066_v35, %v1939_v42  ;;  %v1946_v25 = vor.u32 %v2070_v12, %v1945_v44 }
 0x166   :  { %v626_v4 = vsel %vm2855_vm5, %v621_v13, %v623_v14 }
 0x167   :  { %1600 = vmatpush.bf16.msrb.mxu2 %v1942_v0  ;;  %1626 = vmatpush.bf16.msra.mxu1 %v1946_v25  ;;  %v840_v15 = vpop.permute.xlu1 %839  ;;  %v655_v17 = vpop.permute.xlu0 %654  ;;  %630 = vst [vmem:[#allocation2 + $0x8c] sm:$0xf] %v626_v4 }
 0x168   :  { %v843_v19 = vrot.slane %v840_v15, 4  ;;  %v657_v32 = vrot.slane %v655_v17, 4 }
 0x16a   :  { %v845_v21 = vsel %vm53_vm0, %v843_v19, %v844_v38  ;;  %v658_v22 = vsel %vm53_vm0, %v656_v5, %v657_v32  ;;  %v660_v51 = vsel %vm2856_vm6, %v655_v17, %v657_v32 }
 0x16b   :  { %v846_v23 = vsel %vm378_vm2, %v840_v15, %v845_v21  ;;  %v659_v24 = vsel %vm2857_vm8, %v2740_v11, %v658_v22  ;;  %664 = vst [vmem:[#allocation2 + $0xbc] sm:$0xf] %v660_v51  ;;  %v2783_v26 = vpop.permute.xlu2 %822  ;;  %v2024_v38 = vld [vmem:[#allocation2 + $0x9c] sm:$0xf]  ;;  %v1777_v39 = vld [vmem:[#allocation2 + $0xa0] sm:$0xf] }
 0x16c   :  { %850 = vst [vmem:[#allocation2 + $0x1bc] sm:$0xff] %v846_v23  ;;  %vm2858_vm2 = vcmask 252928   ;;  %v826_v5 = vrot.slane %v2783_v26, 4 }
 0x16d   :  { %663 = vst [vmem:[#allocation2 + $0xb4] sm:$0xff] %v659_v24  ;;  %vm2861_vm11 = vmmov %vm2858_vm2 }
 0x16f   :  { %v859_v27 = vpop.permute.xlu1 %858  ;;  %v857_v28 = vpop.permute.xlu0 %856 }
 0x170   :  { %v861_v30 = vrot.slane %v859_v27, 4  ;;  %v860_v29 = vrot.slane %v857_v28, 4 }
 0x172   :  { %v864_v36 = vsel %vm396_vm13, %v859_v27, %v861_v30  ;;  %v862_v3 = vsel %vm53_vm0, %v860_v29, %v861_v30 }
 0x173   :  { %868 = vst [vmem:[#allocation2 + $0x1dc] sm:$0xf] %v864_v36  ;;  %v863_v11 = vsel %vm396_vm13, %v857_v28, %v862_v3  ;;  %v2791_v43 = vpop.permute.xlu2 %569  ;;  %v2060_v54 = vld [vmem:[#allocation2 + $0x1bc] sm:$0xf]  ;;  %v1921_v55 = vld [vmem:[#allocation2 + $0x1c0] sm:$0xf] }
 0x174   :  { %867 = vst [vmem:[#allocation2 + $0x1d4] sm:$0xff] %v863_v11  ;;  %v1771_v40 = vld [vmem:[#allocation2 + $0xb0] sm:$0xf0]  ;;  %v2028_v2 = vld [vmem:[#allocation2 + $0xb4] sm:$0xf0]  ;;  %v572_v45 = vrot.slane %v2791_v43, 4 }
 0x175   :  { %v1774_v46 = vor.u32 %v2024_v38, %v1771_v40  ;;  %v1778_v37 = vor.u32 %v2028_v2, %v1777_v39  ;;  %v1875_v3 = vld [vmem:[#allocation2 + $0x178] sm:$0xf0] }
 0x176   :  { %v575_v47 = vsel %vm2858_vm2, %v2791_v43, %v572_v45 }
 0x177   :  { %1586 = vmatpush.bf16.msrb.mxu0 %v1774_v46  ;;  %1612 = vmatpush.bf16.msra.mxu3 %v1778_v37  ;;  %v619_v63 = vpop.permute.xlu1 %618  ;;  %v604_v48 = vpop.permute.xlu0 %603  ;;  %579 = vst [vmem:[#allocation2 + $0x44] sm:$0xf] %v575_v47  ;;  %v2043_v37 = vld [vmem:[#allocation2 + $0x134] sm:$0xf] }
 0x178   :  { %v622_v49 = vrot.slane %v619_v63, 4  ;;  %v606_v50 = vrot.slane %v604_v48, 4 }
 0x17a   :  { %v624_v16 = vsel %vm53_vm0, %v622_v49, %v623_v14  ;;  %v607_v52 = vsel %vm53_vm0, %v605_v20, %v606_v50  ;;  %v609_v53 = vsel %vm127_vm7, %v604_v48, %v606_v50  ;;  %v1851_v50 = vld [vmem:[#allocation2 + $0x148] sm:$0xf0] }
 0x17b   :  { %v625_v56 = vsel %vm2859_vm9, %v619_v63, %v624_v16  ;;  %v608_v57 = vsel %vm127_vm7, %v2768_v18, %v607_v52  ;;  %613 = vst [vmem:[#allocation2 + $0x74] sm:$0xf] %v609_v53  ;;  %v1915_v58 = vld [vmem:[#allocation2 + $0x1d0] sm:$0xf0]  ;;  %v2064_v62 = vld [vmem:[#allocation2 + $0x1d4] sm:$0xf0]  ;;  %v2806_v31 = vpop.permute.xlu2 %533  ;;  %v1854_v16 = vor.u32 %v2043_v37, %v1851_v50 }
 0x17c   :  { %629 = vst [vmem:[#allocation2 + $0x84] sm:$0xff] %v625_v56  ;;  %v1918_v33 = vor.u32 %v2060_v54, %v1915_v58  ;;  %v1922_v1 = vor.u32 %v2064_v62, %v1921_v55  ;;  %vm2860_vm7 = vcmask 261120   ;;  %v537_v48 = vrot.slane %v2806_v31, 4 }
 0x17d   :  { %612 = vst [vmem:[#allocation2 + $0x6c] sm:$0xff] %v608_v57  ;;  %v2037_v57 = vld [vmem:[#allocation2 + $0x104] sm:$0xf]  ;;  %vm2865_vm13 = vmmov %vm2860_vm7 }
 0x17e   :  { %1601 = vmatpush.bf16.msrb.mxu2 %v1918_v33  ;;  %1627 = vmatpush.bf16.msra.mxu1 %v1922_v1 }
 0x17f   :  { %v808_v6 = vpop.permute.xlu1 %807  ;;  %v806_v7 = vpop.permute.xlu0 %805 }
 0x180   :  { %v810_v8 = vrot.slane %v808_v6, 4  ;;  %v809_v9 = vrot.slane %v806_v7, 4 }
 0x182   :  { %v813_v10 = vsel %vm342_vm10, %v808_v6, %v810_v8  ;;  %v811_v41 = vsel %vm53_vm0, %v809_v9, %v810_v8  ;;  %v1827_v8 = vld [vmem:[#allocation2 + $0x118] sm:$0xf0] }
 0x183   :  { %817 = vst [vmem:[#allocation2 + $0x194] sm:$0xf] %v813_v10  ;;  %v812_v18 = vsel %vm342_vm10, %v806_v7, %v811_v41  ;;  %v1747_v42 = vld [vmem:[#allocation2 + $0x80] sm:$0xf0]  ;;  %v2022_v12 = vld [vmem:[#allocation2 + $0x84] sm:$0xf0]  ;;  %v553_v13 = vpop.permute.xlu2 %552  ;;  %v1830_v9 = vor.u32 %v2037_v57, %v1827_v8  ;;  %v1318_v41 = vunpack.c.h.b16 %v2733_v60 }
 0x184   :  { %816 = vst [vmem:[#allocation2 + $0x18c] sm:$0xff] %v812_v18  ;;  %v2018_v35 = vld [vmem:[#allocation2 + $0x6c] sm:$0xf]  ;;  %v1753_v44 = vld [vmem:[#allocation2 + $0x70] sm:$0xf]  ;;  %v555_v14 = vrot.slane %v553_v13, 4 }
 0x185   :  { %v1750_v0 = vor.u32 %v2018_v35, %v1747_v42  ;;  %v1754_v25 = vor.u32 %v2022_v12, %v1753_v44  ;;  %v1803_v10 = vld [vmem:[#allocation2 + $0xe8] sm:$0xf0]  ;;  %v2031_v18 = vld [vmem:[#allocation2 + $0xd4] sm:$0xf]  ;;  %v1402_v35 = vpack.c.b16 %v1318_v41, %v1318_v41 }
 0x186   :  { %v558_v4 = vsel %vm2860_vm7, %v553_v13, %v555_v14  ;;  %v1806_v42 = vor.u32 %v2031_v18, %v1803_v10  ;;  %v1779_v13 = vld [vmem:[#allocation2 + $0xb8] sm:$0xf0]  ;;  %v1995_v60 = vld [vmem:[#allocation2 + $0x268] sm:$0xf0] }
 0x187   :  { %1587 = vmatpush.bf16.msrb.mxu0 %v1750_v0  ;;  %1613 = vmatpush.bf16.msra.mxu3 %v1754_v25  ;;  %v568_v15 = vpop.permute.xlu1 %567  ;;  %v825_v17 = vpop.permute.xlu0 %824  ;;  %562 = vst [vmem:[#allocation2 + $0x2c] sm:$0xf] %v558_v4  ;;  %v2025_v4 = vld [vmem:[#allocation2 + $0xa4] sm:$0xf] }
 0x188   :  { %v571_v19 = vrot.slane %v568_v15, 4  ;;  %v827_v32 = vrot.slane %v825_v17, 4 }
 0x18a   :  { %v573_v21 = vsel %vm53_vm0, %v571_v19, %v572_v45  ;;  %v828_v22 = vsel %vm53_vm0, %v826_v5, %v827_v32  ;;  %v830_v51 = vsel %vm360_vm4, %v825_v17, %v827_v32  ;;  %v2049_v45 = vld [vmem:[#allocation2 + $0x164] sm:$0xf]  ;;  %v1502_v17 = vsel %vm53_vm0, %v1402_v35, 0  ;;  %v2019_v5 = vld [vmem:[#allocation2 + $0x74] sm:$0xf] }
 0x18b   :  { %v574_v23 = vsel %vm2861_vm11, %v568_v15, %v573_v21  ;;  %v829_v24 = vsel %vm360_vm4, %v2783_v26, %v828_v22  ;;  %834 = vst [vmem:[#allocation2 + $0x1ac] sm:$0xf] %v830_v51  ;;  %v2054_v38 = vld [vmem:[#allocation2 + $0x18c] sm:$0xf]  ;;  %v1897_v39 = vld [vmem:[#allocation2 + $0x190] sm:$0xf]  ;;  %v1878_v46 = vor.u32 %v2049_v45, %v1875_v3  ;;  %vm2866_vm4 = vmmov %vm2864_vm15  ;;  %v1782_v15 = vor.u32 %v2025_v4, %v1779_v13 }
 0x18c   :  { %578 = vst [vmem:[#allocation2 + $0x3c] sm:$0xff] %v574_v23  ;;  %v1755_v19 = vld [vmem:[#allocation2 + $0x88] sm:$0xf0]  ;;  %v2079_v32 = vld [vmem:[#allocation2 + $0x254] sm:$0xf] }
 0x18d   :  { %833 = vst [vmem:[#allocation2 + $0x1a4] sm:$0xff] %v829_v24  ;;  %v1758_v21 = vor.u32 %v2019_v5, %v1755_v19  ;;  %v1998_v22 = vor.u32 %v2079_v32, %v1995_v60  ;;  %v1971_v23 = vld [vmem:[#allocation2 + $0x238] sm:$0xf0]  ;;  %v2013_v24 = vld [vmem:[#allocation2 + $0x44] sm:$0xf] }
 0x18e   :  { %v1947_v3 = vld [vmem:[#allocation2 + $0x208] sm:$0xf0] }
 0x18f   :  { %v587_v27 = vpop.permute.xlu1 %586  ;;  %v585_v28 = vpop.permute.xlu0 %584 }
 0x190   :  { %v589_v61 = vrot.slane %v587_v27, 4  ;;  %v588_v30 = vrot.slane %v585_v28, 4 }
 0x192   :  { %v592_v29 = vsel %vm2862_vm12, %v587_v27, %v589_v61  ;;  %v590_v36 = vsel %vm53_vm0, %v588_v30, %v589_v61  ;;  %v2073_v27 = vld [vmem:[#allocation2 + $0x224] sm:$0xf] }
 0x193   :  { %596 = vst [vmem:[#allocation2 + $0x5c] sm:$0xf] %v592_v29  ;;  %v591_v11 = vsel %vm2863_vm14, %v585_v28, %v590_v36  ;;  %v2012_v55 = vld [vmem:[#allocation2 + $0x3c] sm:$0xf]  ;;  %v1729_v56 = vld [vmem:[#allocation2 + $0x40] sm:$0xf]  ;;  %v1974_v61 = vor.u32 %v2073_v27, %v1971_v23 }
 0x194   :  { %595 = vst [vmem:[#allocation2 + $0x54] sm:$0xff] %v591_v11  ;;  %v1891_v43 = vld [vmem:[#allocation2 + $0x1a0] sm:$0xf0]  ;;  %v2058_v26 = vld [vmem:[#allocation2 + $0x1a4] sm:$0xf0] }
 0x195   :  { %v1894_v40 = vor.u32 %v2054_v38, %v1891_v43  ;;  %v1898_v2 = vor.u32 %v2058_v26, %v1897_v39  ;;  %v2067_v29 = vld [vmem:[#allocation2 + $0x1f4] sm:$0xf]  ;;  %v1707_v36 = vld [vmem:[#allocation2 + $0x28] sm:$0xf0]  ;;  %v1923_v39 = vld [vmem:[#allocation2 + $0x1d8] sm:$0xf0] }
 0x196   :  { %v1950_v38 = vor.u32 %v2067_v29, %v1947_v3  ;;  %v2061_v43 = vld [vmem:[#allocation2 + $0x1c4] sm:$0xf] }
 0x197   :  { %1602 = vmatpush.bf16.msrb.mxu2 %v1894_v40  ;;  %1628 = vmatpush.bf16.msra.mxu1 %v1898_v2  ;;  %v551_v47 = vpop.permute.xlu1 %550  ;;  %v536_v63 = vpop.permute.xlu0 %535  ;;  %v1926_v26 = vor.u32 %v2061_v43, %v1923_v39  ;;  %v1899_v40 = vld [vmem:[#allocation2 + $0x1a8] sm:$0xf0]  ;;  %v2055_v2 = vld [vmem:[#allocation2 + $0x194] sm:$0xf] }
 0x198   :  { %v554_v20 = vrot.slane %v551_v47, 4  ;;  %v538_v49 = vrot.slane %v536_v63, 4  ;;  %v1902_v45 = vor.u32 %v2055_v2, %v1899_v40 }
 0x19a   :  { %v556_v52 = vsel %vm53_vm0, %v554_v20, %v555_v14  ;;  %v539_v53 = vsel %vm53_vm0, %v537_v48, %v538_v49  ;;  %v541_v54 = vsel %vm2864_vm15, %v536_v63, %v538_v49  ;;  %2002 = vmatmul.msk.bf16.vlgmr.msrb.gmra.mxu2 %vm342_vm10, %v2704_v59  ;;  %2003 = vmatmul.msk.bf16.vlgmr.msra.gmra.mxu1 %vm342_vm10, %v2704_v59  ;;  %v1731_v51 = vld [vmem:[#allocation2 + $0x58] sm:$0xf0] }
 0x19b   :  { %1634 = vmatpush.bf16.msra.mxu2 %v1878_v46  ;;  %v557_v58 = vsel %vm2865_vm13, %v551_v47, %v556_v52  ;;  %v540_v62 = vsel %vm2866_vm4, %v2806_v31, %v539_v53  ;;  %545 = vst [vmem:[#allocation2 + $0x14] sm:$0xf] %v541_v54  ;;  %v1723_v33 = vld [vmem:[#allocation2 + $0x50] sm:$0xf0]  ;;  %v2016_v1 = vld [vmem:[#allocation2 + $0x54] sm:$0xf0]  ;;  %v1734_v28 = vor.u32 %v2013_v24, %v1731_v51 }
 0x19c   :  { %561 = vst [vmem:[#allocation2 + $0x24] sm:$0xff] %v557_v58  ;;  %v1726_v6 = vor.u32 %v2012_v55, %v1723_v33  ;;  %v1730_v7 = vor.u32 %v2016_v1, %v1729_v56 }
 0x19d   :  { %544 = vst [vmem:[#allocation2 + $0xc] sm:$0xff] %v540_v62 }
 0x19e   :  { %1588 = vmatpush.bf16.msrb.mxu0 %v1726_v6  ;;  %1614 = vmatpush.bf16.msra.mxu3 %v1730_v7 }
 0x19f   :  { %1635 = vmatpush.bf16.msra.mxu2 %v1854_v16 }
 0x1a2   :  { %v2007_v30 = vld [vmem:[#allocation2 + $0x14] sm:$0xf] }
 0x1a3   :  { %1636 = vmatpush.bf16.msra.mxu2 %v1830_v9  ;;  %v1699_v12 = vld [vmem:[#allocation2 + $0x20] sm:$0xf0]  ;;  %v2010_v31 = vld [vmem:[#allocation2 + $0x24] sm:$0xf0]  ;;  %v1710_v11 = vor.u32 %v2007_v30, %v1707_v36 }
 0x1a4   :  { %v2006_v44 = vld [vmem:[#allocation2 + $0xc] sm:$0xf]  ;;  %v1705_v14 = vld [vmem:[#allocation2 + $0x10] sm:$0xf] }
 0x1a5   :  { %v1702_v0 = vor.u32 %v2006_v44, %v1699_v12  ;;  %v1706_v25 = vor.u32 %v2010_v31, %v1705_v14 }
 0x1a7   :  { %1637 = vmatpush.bf16.msra.mxu2 %v1806_v42  ;;  %1589 = vmatpush.bf16.msrb.mxu0 %v1702_v0 }
 0x1a8   :  { %1615 = vmatpush.bf16.msra.mxu3 %v1706_v25 }
 0x1aa   :  { %1590 = vmatmul.bf16.vlgmr.msrb.gmra.mxu0 %v2786_v34 }
 0x1ab   :  { %1638 = vmatpush.bf16.msra.mxu2 %v1782_v15  ;;  %1649 = vmatpush.bf16.msra.mxu0 %v1502_v17 }
 0x1ac   :  { %1616 = vmatmul.bf16.vlgmr.msra.gmra.mxu3 %v2786_v34 }
 0x1af   :  { %1639 = vmatpush.bf16.msra.mxu2 %v1758_v21  ;;  %1650 = vmatpush.bf16.msra.mxu0 %v1998_v22 }
 0x1b3   :  { %1640 = vmatpush.bf16.msra.mxu2 %v1734_v28  ;;  %1651 = vmatpush.bf16.msra.mxu0 %v1974_v61 }
 0x1b7   :  { %1641 = vmatpush.bf16.msra.mxu2 %v1710_v11  ;;  %1652 = vmatpush.bf16.msra.mxu0 %v1950_v38  ;;  %v1526_v46 = vpop.f32.mrf.mxu1 }
 0x1ba   :  { %1642 = vmatmul.bf16.vlgmr.msra.gmra.mxu2 %v2786_v34 }
 0x1bb   :  { %1653 = vmatpush.bf16.msra.mxu0 %v1926_v26 }
 0x1bd   :  { %v1552_v37 = vpop.f32.mrf.mxu3 }
 0x1bf   :  { %1654 = vmatpush.bf16.msra.mxu0 %v1902_v45  ;;  %v1528_v47 = vpop.f32.mrf.mxu1 }
 0x1c2   :  { %2004 = vmatmul.msk.bf16.vlgmr.msra.gmra.mxu0 %vm342_vm10, %v2704_v59 }
 0x1c5   :  { %v1554_v63 = vpop.f32.mrf.mxu3 }
 0x1d5   :  { %v1578_v48 = vpop.f32.mrf.mxu3 }
 0x1dd   :  { %v1580_v20 = vpop.f32.mrf.mxu3  ;;  %v1513_v49 = vpop.f32.mrf.mxu0 }
 0x1de   :  { %v1527_v50 = vadd.f32 %v1526_v46, %v1513_v49  ;;  %v1565_v16 = vpop.f32.mrf.mxu1 }
 0x1df   :  { %v1579_v52 = vadd.f32 %v1578_v48, %v1565_v16 }
 0x1e0   :  { %1660 = vst [vmem:[#allocation8] sm:$0xff] %v1527_v50 }
 0x1e1   :  { %1662 = vst [vmem:[#allocation8 + $0x10] sm:$0xff] %v1579_v52 }
 0x1e3   :  { %v1539_v34 = vpop.f32.mrf.mxu2 }
 0x1e4   :  { %v1553_v53 = vadd.f32 %v1552_v37, %v1539_v34 }
 0x1e5   :  { %v1515_v54 = vpop.f32.mrf.mxu0 }
 0x1e6   :  { %1661 = vst [vmem:[#allocation8 + $0x8] sm:$0xff] %v1553_v53  ;;  %v1567_v55 = vpop.f32.mrf.mxu1 }
 0x1eb   :  { %v1541_v56 = vpop.f32.mrf.mxu2 }
 0x217   :  { %v1630_v57 = vpop.f32.mrf.mxu1 }
 0x21d   :  { %v1604_v59 = vpop.f32.mrf.mxu2 }
 0x21f   :  { %v1632_v58 = vpop.f32.mrf.mxu1 }
 0x225   :  { %v1606_v62 = vpop.f32.mrf.mxu2 }
 0x227   :  { %v1591_v33 = vpop.f32.mrf.mxu0 }
 0x228   :  { %v1605_v1 = vadd.f32 %v1604_v59, %v1591_v33 }
 0x22a   :  { %1664 = vst [vmem:[#allocation8 + $0x18] sm:$0xff] %v1605_v1 }
 0x22f   :  { %v1617_v6 = vpop.f32.mrf.mxu3  ;;  %v1593_v8 = vpop.f32.mrf.mxu0 }
 0x230   :  { %v1631_v7 = vadd.f32 %v1630_v57, %v1617_v6 }
 0x232   :  { %1665 = vst [vmem:[#allocation8 + $0x20] sm:$0xff] %v1631_v7 }
 0x237   :  { %v1619_v9 = vpop.f32.mrf.mxu3 }
 0x23d   :  { %v1643_v10 = vpop.f32.mrf.mxu2 }
 0x23f   :  { %v1656_v41 = vpop.f32.mrf.mxu0 }
 0x240   :  { %v1657_v18 = vadd.f32 %v1656_v41, %v1643_v10 }
 0x242   :  { %1666 = vst [vmem:[#allocation8 + $0x28] sm:$0xff] %v1657_v18 }
 0x243   :  { %1679 = dma.vmem_to_hbm [thread:$0]  %s1672_s17, 768, %s1674_s20, [#allocation5], %s2223_s0, %s2223_s0, %s2224_s21  }
 0x245   :  { %v1645_v42 = vpop.f32.mrf.mxu2 }
 0x247   :  { %v1658_v12 = vpop.f32.mrf.mxu0 }
 0x248   :  { %2191 = dma.done.wait [#allocation5], 768  }
 0x249   :  { %2192 = vsyncadd [#allocation5], 4294966528 }
 0x24a   :  { %1684 = vsyncpa [#allocation4], 1 }
 0x24b   :  { %1685 = vsyncpa [#allocation7], 1 }
 0x24c   :  { %1686 = vsyncpa [#allocation5], 1 }

</bundles_post_ra>
